<compile_context>
chip_gen: v7x
topology: tpu7x:2x2x1
jax: 0.10.0
libtpu: 0.0.40
codegen_flags: <defaults>
</compile_context>

<pallas_src>
import functools

import jax
import jax.numpy as jnp
from jax.experimental import pallas as pl
from jax.experimental.pallas import tpu as pltpu

POOL = 7        # cfg.POOLING_SIZE
TM = 256        # row tile for matmul kernels
KMAX = 2048     # max contraction tile for the tiled matmul
NMAX = 512      # max output-column tile for the tiled matmul


def _ceil128(n):
    return ((n + 127) // 128) * 128


def _pick_tile(dim, cap):
    """Largest tile <= cap that is a multiple of 128 and divides dim, else dim."""
    if dim <= cap:
        return dim
    t = (cap // 128) * 128
    while t >= 128:
        if dim % t == 0:
            return t
        t -= 128
    return dim


# ----------------------------------------------------------------------------
# Tiled matmul + bias (+ReLU) with VMEM f32 accumulator
# ----------------------------------------------------------------------------
def _matmul_bias_kernel(x_ref, w_ref, b_ref, o_ref, acc_ref, *, relu):
    """One (tm, tn) output tile, accumulated over the k grid axis."""
    @pl.when(pl.program_id(2) == 0)
    def _init():
        acc_ref[...] = jnp.zeros_like(acc_ref)

    acc_ref[...] += jnp.dot(x_ref[...], w_ref[...],
                            preferred_element_type=jnp.float32)

    @pl.when(pl.program_id(2) == pl.num_programs(2) - 1)
    def _finalize():
        acc = acc_ref[...] + b_ref[...]
        if relu:
            acc = jnp.maximum(acc, 0.0)
        o_ref[...] = acc.astype(o_ref.dtype)


def matmul_bias(x, w, b, *, relu=False, out_dtype=jnp.float32):
    """y = relu?(x @ w + b).  x (M,K) bf16, w (K,N) bf16 prepacked, b (1,N) f32.

    K and N are tiled (k axis last, "arbitrary") with a resident f32 VMEM
    accumulator so production-size weights never have to be whole-K/whole-N
    resident.  Ragged M is handled by cdiv tiling (tail garbage rows are
    computed row-wise only and dropped on store).
    """
    M, K = x.shape
    N = w.shape[1]
    tm = min(TM, M)
    tk = _pick_tile(K, KMAX)
    tn = _pick_tile(N, NMAX)
    grid = (pl.cdiv(M, tm), N // tn, K // tk)
    return pl.pallas_call(
        functools.partial(_matmul_bias_kernel, relu=relu),
        out_shape=jax.ShapeDtypeStruct((M, N), out_dtype),
        grid_spec=pltpu.PrefetchScalarGridSpec(
            num_scalar_prefetch=0,
            grid=grid,
            in_specs=[pl.BlockSpec((tm, tk), lambda i, j, k: (i, k)),
                      pl.BlockSpec((tk, tn), lambda i, j, k: (k, j)),
                      pl.BlockSpec((1, tn), lambda i, j, k: (0, j))],
            out_specs=pl.BlockSpec((tm, tn), lambda i, j, k: (i, j)),
            scratch_shapes=[pltpu.VMEM((tm, tn), jnp.float32)]),
        compiler_params=pltpu.CompilerParams(
            dimension_semantics=("parallel", "parallel", "arbitrary")),
    )(x, w, b)


# ----------------------------------------------------------------------------
# 3x3 conv (+ fused RPN heads variant)
# ----------------------------------------------------------------------------
def _conv3x3_body(x_f32, w9, bias, H, W, Cin, Cout):
    """3x3 SAME conv + bias + ReLU for one image.

    x_f32: (H+2, W+2, Cin) f32 (the bf16 block is up-cast exactly once);
    w9: (9, Cin, Cout) bf16 prepacked; bias: (1, Cout) f32.
    Returns (H*W, Cout) f32.  The 9 taps accumulate bf16 MXU dots into one
    f32 accumulator, so the activation is read from HBM once.
    # TODO(synk): fuse the 9 taps into a single (H*W, 9*Cin) im2col dot in VMEM
    # for 9x deeper MXU contraction once unaligned bf16 lane-concat is validated.
    """
    acc = jnp.zeros((H * W, Cout), jnp.float32)
    t = 0
    for dh in range(3):
        for dw in range(3):
            patch = x_f32[dh:dh + H, dw:dw + W, :].reshape(H * W, Cin)
            acc = acc + jnp.dot(patch.astype(jnp.bfloat16), w9[t],
                                preferred_element_type=jnp.float32)
            t += 1
    return jnp.maximum(acc + bias, 0.0)


def _conv3x3_kernel(x_ref, w_ref, b_ref, o_ref, *, H, W, Cin, Cout):
    x = x_ref[0].astype(jnp.float32)
    act = _conv3x3_body(x, w_ref[...], b_ref[...], H, W, Cin, Cout)
    o_ref[0] = act.reshape(H, W, Cout).astype(o_ref.dtype)


def conv3x3_relu(x, w9, b):
    """x (B,H,W,Cin) bf16; w9 (9,Cin,Cout) bf16 prepacked; b (1,Cout) f32 -> bf16."""
    B, H, W, Cin = x.shape
    Cout = w9.shape[-1]
    xp = jnp.pad(x, ((0, 0), (1, 1), (1, 1), (0, 0)))         # halo pad only
    # TODO(synk): for production feature maps, row-tile with a halo
    # (grid=(B, H/tile_h)) so the block fits v7x's 64 MiB VMEM and the
    # DMA pipeline / second TensorCore get work; whole-image blocks are fine
    # at demo sizes.
    return pl.pallas_call(
        functools.partial(_conv3x3_kernel, H=H, W=W, Cin=Cin, Cout=Cout),
        out_shape=jax.ShapeDtypeStruct((B, H, W, Cout), jnp.bfloat16),
        grid_spec=pltpu.PrefetchScalarGridSpec(
            num_scalar_prefetch=0,
            grid=(B,),
            in_specs=[pl.BlockSpec((1, H + 2, W + 2, Cin),
                                   lambda bi: (bi, 0, 0, 0)),
                      pl.BlockSpec((9, Cin, Cout), lambda bi: (0, 0, 0)),
                      pl.BlockSpec((1, Cout), lambda bi: (0, 0))],
            out_specs=pl.BlockSpec((1, H, W, Cout), lambda bi: (bi, 0, 0, 0))),
        compiler_params=pltpu.CompilerParams(
            dimension_semantics=("parallel",)),
    )(xp, w9, b)


def _rpn_conv_head_kernel(x_ref, wc_ref, bc_ref, wh_ref, bh_ref, o_ref,
                          *, H, W, Cin, Cout, Nh):
    """Fused RPN: 3x3 conv + ReLU, then 1x1 [cls|bbox] heads, all in VMEM.

    rpn_feat never round-trips to HBM; only the lane-padded (Nh=128) head
    output is stored (lane-dense vst).
    """
    x = x_ref[0].astype(jnp.float32)
    feat = _conv3x3_body(x, wc_ref[...], bc_ref[...], H, W, Cin, Cout)
    head = jnp.dot(feat.astype(jnp.bfloat16), wh_ref[...],
                   preferred_element_type=jnp.float32) + bh_ref[...]
    o_ref[0] = head.reshape(H, W, Nh)


def rpn_conv_heads(x, wc, bc, wh, bh):
    """x (B,H,W,Cin) bf16; wc (9,Cin,Cout) bf16; wh (Cout,Nh) bf16 -> (B,H,W,Nh) f32."""
    B, H, W, Cin = x.shape
    Cout = wc.shape[-1]
    Nh = wh.shape[-1]
    xp = jnp.pad(x, ((0, 0), (1, 1), (1, 1), (0, 0)))
    return pl.pallas_call(
        functools.partial(_rpn_conv_head_kernel, H=H, W=W, Cin=Cin,
                          Cout=Cout, Nh=Nh),
        out_shape=jax.ShapeDtypeStruct((B, H, W, Nh), jnp.float32),
        grid_spec=pltpu.PrefetchScalarGridSpec(
            num_scalar_prefetch=0,
            grid=(B,),
            in_specs=[pl.BlockSpec((1, H + 2, W + 2, Cin),
                                   lambda bi: (bi, 0, 0, 0)),
                      pl.BlockSpec((9, Cin, Cout), lambda bi: (0, 0, 0)),
                      pl.BlockSpec((1, Cout), lambda bi: (0, 0)),
                      pl.BlockSpec((Cout, Nh), lambda bi: (0, 0)),
                      pl.BlockSpec((1, Nh), lambda bi: (0, 0))],
            out_specs=pl.BlockSpec((1, H, W, Nh), lambda bi: (bi, 0, 0, 0))),
        compiler_params=pltpu.CompilerParams(
            dimension_semantics=("parallel",)),
    )(xp, wc, bc, wh, bh)


# ----------------------------------------------------------------------------
# Fused RCNN tail: fc2 + ReLU + [bbox|cls] heads + in-kernel class softmax
# ----------------------------------------------------------------------------
def _class_softmax(out, lo, hi):
    """Row softmax over columns [lo, hi); all other columns pass through."""
    col = jax.lax.broadcasted_iota(jnp.int32, out.shape, 1)
    is_cls = (col >= lo) & (col < hi)
    m = jnp.max(jnp.where(is_cls, out, -jnp.inf), axis=-1, keepdims=True)
    # Mask BEFORE the exp so large bbox-column logits never reach the EUP.
    e = jnp.where(is_cls, jnp.exp(jnp.where(is_cls, out - m, 0.0)), 0.0)
    s = jnp.sum(e, axis=-1, keepdims=True)
    return jnp.where(is_cls, e * pl.reciprocal(s, approx=True), out)


def _fc_tail_kernel(x_ref, w2_ref, b2_ref, wh_ref, bh_ref, o_ref, *, softmax_cols):
    h = jnp.dot(x_ref[...], w2_ref[...], preferred_element_type=jnp.float32)
    h = jnp.maximum(h + b2_ref[...], 0.0)
    out = jnp.dot(h.astype(jnp.bfloat16), wh_ref[...],
                  preferred_element_type=jnp.float32) + bh_ref[...]
    lo, hi = softmax_cols
    o_ref[...] = _class_softmax(out, lo, hi)


def fc_tail(x, w2, b2, wh, bh, *, softmax_cols):
    """Fused fc2+ReLU and fused RCNN heads.  x (M,K2) bf16; output (M,Nt) f32."""
    M, K2 = x.shape
    H2 = w2.shape[1]
    Nt = wh.shape[1]
    tm = min(TM, M)
    return pl.pallas_call(
        functools.partial(_fc_tail_kernel, softmax_cols=softmax_cols),
        out_shape=jax.ShapeDtypeStruct((M, Nt), jnp.float32),
        grid_spec=pltpu.PrefetchScalarGridSpec(
            num_scalar_prefetch=0,
            grid=(pl.cdiv(M, tm),),
            in_specs=[pl.BlockSpec((tm, K2), lambda i: (i, 0)),
                      pl.BlockSpec((K2, H2), lambda i: (0, 0)),
                      pl.BlockSpec((1, H2), lambda i: (0, 0)),
                      pl.BlockSpec((H2, Nt), lambda i: (0, 0)),
                      pl.BlockSpec((1, Nt), lambda i: (0, 0))],
            out_specs=pl.BlockSpec((tm, Nt), lambda i: (i, 0))),
        compiler_params=pltpu.CompilerParams(
            dimension_semantics=("parallel",)),
    )(x, w2, b2, wh, bh)


# ----------------------------------------------------------------------------
# ROI max-pooling (cfg.POOLING_MODE == 'pool'), one image per grid step
# ----------------------------------------------------------------------------
def _roi_pool_kernel(coords_ref, feat_ref, o_ref, *, H, W, C, R):
    """All R ROIs of one image, separable rows-then-cols masked max.

    The (H,W,C) bf16 feature block is DMA'd exactly once per image; ROI coords
    come from SMEM (scalar prefetch).
    """
    b = pl.program_id(0)
    feat = feat_ref[0]                                           # (H, W, C) bf16
    rows2d = jax.lax.broadcasted_iota(jnp.int32, (H, W), 0)
    colsWC = jax.lax.broadcasted_iota(jnp.int32, (W, C), 0)

    def one_roi(r, carry):
        base = b * R + r
        ws = coords_ref[base, 0]
        hs = coords_ref[base, 1]
        we = coords_ref[base, 2]
        he = coords_ref[base, 3]
        roi_w = jnp.maximum(we - ws + 1, 1).astype(jnp.float32)
        roi_h = jnp.maximum(he - hs + 1, 1).astype(jnp.float32)
        bin_h = roi_h / POOL
        bin_w = roi_w / POOL
        out_rows = []
        for ph in range(POOL):
            hstart = jnp.clip(jnp.floor(ph * bin_h).astype(jnp.int32) + hs, 0, H)
            hend = jnp.clip(jnp.ceil((ph + 1) * bin_h).astype(jnp.int32) + hs, 0, H)
            rmask = (rows2d >= hstart) & (rows2d < hend)         # (H, W)
            # Separable reduction: rows collapsed once per ph (bf16 data).
            strip = jnp.max(jnp.where(rmask[:, :, None], feat, -jnp.inf), axis=0)
            strip = strip.astype(jnp.float32)                    # (W, C)
            h_empty = hend <= hstart
            for pw in range(POOL):
                wstart = jnp.clip(jnp.floor(pw * bin_w).astype(jnp.int32) + ws, 0, W)
                wend = jnp.clip(jnp.ceil((pw + 1) * bin_w).astype(jnp.int32) + ws, 0, W)
                cmask = (colsWC >= wstart) & (colsWC < wend)     # (W, C)
                val = jnp.max(jnp.where(cmask, strip, -jnp.inf),
                              axis=0, keepdims=True)             # (1, C)
                is_empty = jnp.logical_or(h_empty, wend <= wstart)
                out_rows.append(jnp.where(is_empty, 0.0, val))   # empty bin -> 0
        pooled = jnp.concatenate(out_rows, axis=0)               # (49, C) f32
        o_ref[0, r] = pooled.astype(o_ref.dtype)
        return carry

    jax.lax.fori_loop(0, R, one_roi, 0)


def roi_pool(base_feat, rois, spatial_scale=1.0):
    """ROI max-pool.  base_feat (B,H,W,C) bf16; rois (B,R,5)=[batch,x1,y1,x2,y2]."""
    B, H, W, C = base_feat.shape
    R = rois.shape[1]
    # round-half-away-from-zero for non-negative coords (matches PyTorch ROIPool)
    coords = jnp.floor(rois[..., 1:5] * spatial_scale + 0.5).astype(jnp.int32)
    coords = coords.reshape(B * R, 4)          # batch-sorted by construction
    return pl.pallas_call(
        functools.partial(_roi_pool_kernel, H=H, W=W, C=C, R=R),
        out_shape=jax.ShapeDtypeStruct((B, R, POOL * POOL, C), jnp.bfloat16),
        grid_spec=pltpu.PrefetchScalarGridSpec(
            num_scalar_prefetch=1,
            grid=(B,),
            in_specs=[pl.BlockSpec((1, H, W, C),
                                   lambda b, crd: (b, 0, 0, 0))],
            out_specs=pl.BlockSpec((1, R, POOL * POOL, C),
                                   lambda b, crd: (b, 0, 0, 0))),
        compiler_params=pltpu.CompilerParams(
            dimension_semantics=("parallel",)),
    )(coords, base_feat)


# ----------------------------------------------------------------------------
# RPN glue: anchors, bbox decode (plain JAX)
# ----------------------------------------------------------------------------
def generate_anchors(H, W, sizes):
    ys = jnp.arange(H, dtype=jnp.float32)
    xs = jnp.arange(W, dtype=jnp.float32)
    cy, cx = jnp.meshgrid(ys, xs, indexing="ij")              # (H, W)
    anchors = []
    for s in sizes:
        half = s / 2.0
        anchors.append(jnp.stack([cx - half, cy - half, cx + half, cy + half],
                                 axis=-1))
    return jnp.stack(anchors, axis=2)                          # (H, W, A, 4)


def bbox_transform_inv(boxes, deltas):
    widths = boxes[..., 2] - boxes[..., 0] + 1.0
    heights = boxes[..., 3] - boxes[..., 1] + 1.0
    ctr_x = boxes[..., 0] + 0.5 * widths
    ctr_y = boxes[..., 1] + 0.5 * heights
    dx, dy, dw, dh = (deltas[..., 0], deltas[..., 1],
                      deltas[..., 2], deltas[..., 3])
    pcx = dx * widths + ctr_x
    pcy = dy * heights + ctr_y
    pw = jnp.exp(dw) * widths
    ph = jnp.exp(dh) * heights
    return jnp.stack([pcx - 0.5 * pw, pcy - 0.5 * ph,
                      pcx + 0.5 * pw, pcy + 0.5 * ph], axis=-1)


# ----------------------------------------------------------------------------
# Parameters (deterministic synthetic init, mirroring _init_weights std devs)
# ----------------------------------------------------------------------------
def init_params(key, c_in=4, dout=32, A=3, hidden=64, n_classes=5):
    ks = jax.random.split(key, 10)

    def conv_w(k, cin, cout, std=0.01):
        return jax.random.normal(k, (3, 3, cin, cout), jnp.float32) * std

    def lin_w(k, cin, cout, std=0.01):
        return jax.random.normal(k, (cin, cout), jnp.float32) * std

    z = lambda n: jnp.zeros((n,), jnp.float32)
    p = {}
    p["base1_w"] = conv_w(ks[0], c_in, 8);       p["base1_b"] = z(8)
    p["base2_w"] = conv_w(ks[1], 8, 16);         p["base2_b"] = z(16)
    p["base3_w"] = conv_w(ks[2], 16, dout);      p["base3_b"] = z(dout)
    p["rpn_conv_w"] = conv_w(ks[3], dout, dout); p["rpn_conv_b"] = z(dout)
    p["rpn_cls_w"] = lin_w(ks[4], dout, 2 * A);  p["rpn_cls_b"] = z(2 * A)
    p["rpn_bbox_w"] = lin_w(ks[5], dout, 4 * A); p["rpn_bbox_b"] = z(4 * A)
    p["fc1_w"] = lin_w(ks[6], POOL * POOL * dout, hidden); p["fc1_b"] = z(hidden)
    p["fc2_w"] = lin_w(ks[7], hidden, hidden);   p["fc2_b"] = z(hidden)
    p["cls_w"] = lin_w(ks[8], hidden, n_classes, 0.01);  p["cls_b"] = z(n_classes)
    p["bbox_w"] = lin_w(ks[9], hidden, 4 * n_classes, 0.001)
    p["bbox_b"] = z(4 * n_classes)
    return p


def prepack_params(p):
    """One-time weight prepack: bf16 casts, conv (9,Cin,Cout) layout, fused +
    lane-padded RPN/RCNN head weights, bias rows.  Hoisted out of the forward
    so none of this runs (or re-copies HBM) per inference."""
    bf = jnp.bfloat16

    def conv_pack(w):                      # (3,3,Cin,Cout) -> (9,Cin,Cout) bf16
        _, _, ci, co = w.shape
        return w.reshape(9, ci, co).astype(bf)

    def b_row(b):
        return b.reshape(1, -1).astype(jnp.float32)

    pp = {}
    for name in ("base1", "base2", "base3", "rpn_conv"):
        pp[name + "_w"] = conv_pack(p[name + "_w"])
        pp[name + "_b"] = b_row(p[name + "_b"])

    # Fused RPN heads: [cls (2A) | bbox (4A)] padded to a 128-lane output.
    wh = jnp.concatenate([p["rpn_cls_w"], p["rpn_bbox_w"]], axis=1)
    bh = jnp.concatenate([p["rpn_cls_b"], p["rpn_bbox_b"]])
    nh = _ceil128(wh.shape[1])
    pp["rpn_head_w"] = jnp.pad(wh, ((0, 0), (0, nh - wh.shape[1]))).astype(bf)
    pp["rpn_head_b"] = jnp.pad(bh, (0, nh - bh.shape[0])).reshape(1, nh).astype(jnp.float32)

    pp["fc1_w"] = p["fc1_w"].astype(bf)
    pp["fc1_b"] = b_row(p["fc1_b"])
    pp["fc2_w"] = p["fc2_w"].astype(bf)
    pp["fc2_b"] = b_row(p["fc2_b"])

    # Fused RCNN heads: [bbox (4C) | cls (C)] padded to a 128-lane output.
    wt = jnp.concatenate([p["bbox_w"], p["cls_w"]], axis=1)
    bt = jnp.concatenate([p["bbox_b"], p["cls_b"]])
    nt = _ceil128(wt.shape[1])
    pp["rcnn_head_w"] = jnp.pad(wt, ((0, 0), (0, nt - wt.shape[1]))).astype(bf)
    pp["rcnn_head_b"] = jnp.pad(bt, (0, nt - bt.shape[0])).reshape(1, nt).astype(jnp.float32)
    return pp


# ----------------------------------------------------------------------------
# Forward pass of _fasterRCNN (inference path: self.training == False)
# ----------------------------------------------------------------------------
def faster_rcnn_forward(pp, im_data, im_info, gt_boxes, num_boxes,
                        n_anchors=3, n_rois=8, n_classes=5):
    # In eval mode gt_boxes / num_boxes are unused; losses are 0; labels None.
    del gt_boxes, num_boxes
    B = im_data.shape[0]
    A = n_anchors
    x = jnp.transpose(im_data, (0, 2, 3, 1)).astype(jnp.bfloat16)   # NCHW -> NHWC bf16

    # --- backbone: RCNN_base1 / RCNN_base2 / RCNN_base3 (bf16 chain) ---
    f1 = conv3x3_relu(x, pp["base1_w"], pp["base1_b"])
    f2 = conv3x3_relu(f1, pp["base2_w"], pp["base2_b"])
    base_feat = conv3x3_relu(f2, pp["base3_w"], pp["base3_b"])       # bf16
    _, H, W, Cf = base_feat.shape

    # --- RPN (RCNN_rpn): conv + heads fused in one kernel ---
    rpn_out = rpn_conv_heads(base_feat, pp["rpn_conv_w"], pp["rpn_conv_b"],
                             pp["rpn_head_w"], pp["rpn_head_b"])     # (B,H,W,128) f32
    rpn_cls = rpn_out[..., :2 * A]
    rpn_bbox = rpn_out[..., 2 * A:6 * A]

    # RPN objectness: softmax over {bg, fg} == sigmoid(fg - bg).  (bg/fg pairing
    # follows PyTorch's (B,2A,H,W)->(B,2,A*H,W) reshape: channel a with a+A.)
    bg = rpn_cls[..., :A]
    fg = rpn_cls[..., A:2 * A]
    fg_prob = jax.nn.sigmoid(fg - bg).reshape(B, H * W * A)

    sizes = tuple(2.0 * (2.0 ** a) for a in range(A))
    anchors = generate_anchors(H, W, sizes).reshape(1, H * W * A, 4)
    deltas = rpn_bbox.reshape(B, H * W * A, 4)
    proposals = bbox_transform_inv(anchors, deltas)
    im_h = im_info[:, 0].reshape(B, 1)
    im_w = im_info[:, 1].reshape(B, 1)
    proposals = jnp.stack([
        jnp.clip(proposals[..., 0], 0.0, im_w - 1.0),
        jnp.clip(proposals[..., 1], 0.0, im_h - 1.0),
        jnp.clip(proposals[..., 2], 0.0, im_w - 1.0),
        jnp.clip(proposals[..., 3], 0.0, im_h - 1.0)], axis=-1)

    # TODO(synk): NMS inside the RPN proposal layer has no clean Pallas
    # equivalent; proposals are selected by plain top-k objectness instead.
    top_idx = jax.lax.top_k(fg_prob, n_rois)[1]                      # (B, R)
    top_boxes = jax.vmap(lambda p, i: p[i])(proposals, top_idx)      # (B, R, 4)
    batch_col = jnp.broadcast_to(
        jnp.arange(B, dtype=jnp.float32)[:, None, None], (B, n_rois, 1))
    rois = jnp.concatenate([batch_col, top_boxes], axis=-1)          # (B, R, 5)

    # --- ROI pooling (cfg.POOLING_MODE == 'pool') ---
    # Synthetic backbone has stride 1, so spatial_scale = 1.0 here (vs 1/16).
    # TODO(synk): ROIAlign (cfg.POOLING_MODE == 'align') bilinear sampling not
    # implemented; only the 'pool' path is.
    pooled = roi_pool(base_feat, rois, spatial_scale=1.0)            # (B,R,49,Cf) bf16
    pooled_flat = pooled.reshape(B * n_rois, POOL * POOL * Cf)
    # NOTE: flatten order is (h,w,c) instead of PyTorch's (c,h,w); equivalent
    # up to a permutation of the (synthetic) FC input weights.

    # --- _head_to_tail + heads: fc1 (tiled matmul), then fused fc2+heads ---
    h1 = matmul_bias(pooled_flat, pp["fc1_w"], pp["fc1_b"],
                     relu=True, out_dtype=jnp.bfloat16)
    head_out = fc_tail(h1, pp["fc2_w"], pp["fc2_b"],
                       pp["rcnn_head_w"], pp["rcnn_head_b"],
                       softmax_cols=(4 * n_classes, 5 * n_classes))  # (B*R, 128)
    bbox_pred = head_out[:, :4 * n_classes].reshape(B, n_rois, -1)
    cls_prob = head_out[:, 4 * n_classes:5 * n_classes].reshape(B, n_rois, -1)

    rpn_loss_cls = 0.0
    rpn_loss_bbox = 0.0
    RCNN_loss_cls = 0.0
    RCNN_loss_bbox = 0.0
    rois_label = None
    return (rois, cls_prob, bbox_pred, rpn_loss_cls, rpn_loss_bbox,
            RCNN_loss_cls, RCNN_loss_bbox, rois_label, 0, 0)


# ----------------------------------------------------------------------------
if __name__ == "__main__":
    classes = ("__background__", "a", "b", "c", "d")   # n_classes = 5
    n_classes = len(classes)

    key = jax.random.PRNGKey(0)
    k_im, k_p = jax.random.split(key, 2)

    B, C_in, H_im, W_im = 2, 4, 16, 16
    im_data = jax.random.normal(k_im, (B, C_in, H_im, W_im), jnp.float32)  # NCHW
    im_info = jnp.array([[float(H_im), float(W_im), 1.0]] * B, jnp.float32)
    gt_boxes = jnp.zeros((B, 20, 5), jnp.float32)   # unused in inference path
    num_boxes = jnp.zeros((B,), jnp.int32)          # unused in inference path

    params = init_params(k_p, c_in=C_in, n_classes=n_classes)
    packed = prepack_params(params)                  # one-time weight prepack

    out = faster_rcnn_forward(packed, im_data, im_info, gt_boxes, num_boxes,
                              n_classes=n_classes)
    rois, cls_prob, bbox_pred = out[0], out[1], out[2]
    jax.block_until_ready((rois, cls_prob, bbox_pred))

    assert rois.shape == (B, 8, 5)
    assert cls_prob.shape == (B, 8, n_classes)
    assert bbox_pred.shape == (B, 8, 4 * n_classes)
    print("KERNEL_OK")
</pallas_src>

<mosaic_0001>
module attributes {stable_mosaic.version = 11 : i64} {
  func.func @_conv3x3_kernel(%arg0: i32, %arg1: memref<1x18x18x4xbf16, #tpu.memory_space<vmem>>, %arg2: memref<9x4x8xbf16, #tpu.memory_space<vmem>>, %arg3: memref<1x8xf32, #tpu.memory_space<vmem>>, %arg4: memref<1x16x16x8xbf16, #tpu.memory_space<vmem>>) attributes {dimension_semantics = [#tpu.dimension_semantics<parallel>], iteration_bounds = array<i64: 2>, scalar_prefetch = 0 : i64, scratch_operands = 0 : i64, tpu.core_type = #tpu.core_type<tc>, window_params = [{transform_indices = @transform_0, window_bounds = array<i64: 1, 18, 18, 4>}, {pipeline_mode = #tpu.pipeline_mode<synchronous>, transform_indices = @transform_1, window_bounds = array<i64: 9, 4, 8>}, {pipeline_mode = #tpu.pipeline_mode<synchronous>, transform_indices = @transform_2, window_bounds = array<i64: 1, 8>}, {transform_indices = @transform_3, window_bounds = array<i64: 1, 16, 16, 8>}]} {
    %c0 = arith.constant 0 : index
    %c0_0 = arith.constant 0 : index
    %c0_1 = arith.constant 0 : index
    %c0_2 = arith.constant 0 : index
    %0 = vector.load %arg1[%c0, %c0_0, %c0_1, %c0_2] : memref<1x18x18x4xbf16, #tpu.memory_space<vmem>>, vector<1x18x18x4xbf16>
    %1 = vector.shape_cast %0 : vector<1x18x18x4xbf16> to vector<18x18x4xbf16>
    %2 = arith.extf %1 : vector<18x18x4xbf16> to vector<18x18x4xf32>
    %c0_3 = arith.constant 0 : index
    %c0_4 = arith.constant 0 : index
    %c0_5 = arith.constant 0 : index
    %3 = vector.load %arg2[%c0_3, %c0_4, %c0_5] : memref<9x4x8xbf16, #tpu.memory_space<vmem>>, vector<9x4x8xbf16>
    %c0_6 = arith.constant 0 : index
    %c0_7 = arith.constant 0 : index
    %4 = vector.load %arg3[%c0_6, %c0_7] : memref<1x8xf32, #tpu.memory_space<vmem>>, vector<1x8xf32>
    %cst = arith.constant 0.000000e+00 : f32
    %5 = vector.broadcast %cst : f32 to vector<256x8xf32>
    %6 = vector.extract_strided_slice %2 {offsets = [0, 0, 0], sizes = [16, 16, 4], strides = [1, 1, 1]} : vector<18x18x4xf32> to vector<16x16x4xf32>
    %7 = vector.shape_cast %6 : vector<16x16x4xf32> to vector<256x4xf32>
    %8 = arith.truncf %7 : vector<256x4xf32> to vector<256x4xbf16>
    %9 = vector.extract_strided_slice %3 {offsets = [0, 0, 0], sizes = [1, 4, 8], strides = [1, 1, 1]} : vector<9x4x8xbf16> to vector<1x4x8xbf16>
    %10 = vector.shape_cast %9 : vector<1x4x8xbf16> to vector<4x8xbf16>
    %cst_8 = arith.constant dense<0.000000e+00> : vector<256x8xf32>
    %11 = tpu.matmul %8, %10, %cst_8 {dimension_numbers = #tpu.dot_dimension_numbers<[1], [0], [0], [1], [0, 0, 1, 1], [], []>} : vector<256x4xbf16>, vector<4x8xbf16>, vector<256x8xf32> -> vector<256x8xf32>
    %12 = arith.addf %5, %11 : vector<256x8xf32>
    %13 = vector.extract_strided_slice %2 {offsets = [0, 1, 0], sizes = [16, 16, 4], strides = [1, 1, 1]} : vector<18x18x4xf32> to vector<16x16x4xf32>
    %14 = vector.shape_cast %13 : vector<16x16x4xf32> to vector<256x4xf32>
    %15 = arith.truncf %14 : vector<256x4xf32> to vector<256x4xbf16>
    %16 = vector.extract_strided_slice %3 {offsets = [1, 0, 0], sizes = [1, 4, 8], strides = [1, 1, 1]} : vector<9x4x8xbf16> to vector<1x4x8xbf16>
    %17 = vector.shape_cast %16 : vector<1x4x8xbf16> to vector<4x8xbf16>
    %cst_9 = arith.constant dense<0.000000e+00> : vector<256x8xf32>
    %18 = tpu.matmul %15, %17, %cst_9 {dimension_numbers = #tpu.dot_dimension_numbers<[1], [0], [0], [1], [0, 0, 1, 1], [], []>} : vector<256x4xbf16>, vector<4x8xbf16>, vector<256x8xf32> -> vector<256x8xf32>
    %19 = arith.addf %12, %18 : vector<256x8xf32>
    %20 = vector.extract_strided_slice %2 {offsets = [0, 2, 0], sizes = [16, 16, 4], strides = [1, 1, 1]} : vector<18x18x4xf32> to vector<16x16x4xf32>
    %21 = vector.shape_cast %20 : vector<16x16x4xf32> to vector<256x4xf32>
    %22 = arith.truncf %21 : vector<256x4xf32> to vector<256x4xbf16>
    %23 = vector.extract_strided_slice %3 {offsets = [2, 0, 0], sizes = [1, 4, 8], strides = [1, 1, 1]} : vector<9x4x8xbf16> to vector<1x4x8xbf16>
    %24 = vector.shape_cast %23 : vector<1x4x8xbf16> to vector<4x8xbf16>
    %cst_10 = arith.constant dense<0.000000e+00> : vector<256x8xf32>
    %25 = tpu.matmul %22, %24, %cst_10 {dimension_numbers = #tpu.dot_dimension_numbers<[1], [0], [0], [1], [0, 0, 1, 1], [], []>} : vector<256x4xbf16>, vector<4x8xbf16>, vector<256x8xf32> -> vector<256x8xf32>
    %26 = arith.addf %19, %25 : vector<256x8xf32>
    %27 = vector.extract_strided_slice %2 {offsets = [1, 0, 0], sizes = [16, 16, 4], strides = [1, 1, 1]} : vector<18x18x4xf32> to vector<16x16x4xf32>
    %28 = vector.shape_cast %27 : vector<16x16x4xf32> to vector<256x4xf32>
    %29 = arith.truncf %28 : vector<256x4xf32> to vector<256x4xbf16>
    %30 = vector.extract_strided_slice %3 {offsets = [3, 0, 0], sizes = [1, 4, 8], strides = [1, 1, 1]} : vector<9x4x8xbf16> to vector<1x4x8xbf16>
    %31 = vector.shape_cast %30 : vector<1x4x8xbf16> to vector<4x8xbf16>
    %cst_11 = arith.constant dense<0.000000e+00> : vector<256x8xf32>
    %32 = tpu.matmul %29, %31, %cst_11 {dimension_numbers = #tpu.dot_dimension_numbers<[1], [0], [0], [1], [0, 0, 1, 1], [], []>} : vector<256x4xbf16>, vector<4x8xbf16>, vector<256x8xf32> -> vector<256x8xf32>
    %33 = arith.addf %26, %32 : vector<256x8xf32>
    %34 = vector.extract_strided_slice %2 {offsets = [1, 1, 0], sizes = [16, 16, 4], strides = [1, 1, 1]} : vector<18x18x4xf32> to vector<16x16x4xf32>
    %35 = vector.shape_cast %34 : vector<16x16x4xf32> to vector<256x4xf32>
    %36 = arith.truncf %35 : vector<256x4xf32> to vector<256x4xbf16>
    %37 = vector.extract_strided_slice %3 {offsets = [4, 0, 0], sizes = [1, 4, 8], strides = [1, 1, 1]} : vector<9x4x8xbf16> to vector<1x4x8xbf16>
    %38 = vector.shape_cast %37 : vector<1x4x8xbf16> to vector<4x8xbf16>
    %cst_12 = arith.constant dense<0.000000e+00> : vector<256x8xf32>
    %39 = tpu.matmul %36, %38, %cst_12 {dimension_numbers = #tpu.dot_dimension_numbers<[1], [0], [0], [1], [0, 0, 1, 1], [], []>} : vector<256x4xbf16>, vector<4x8xbf16>, vector<256x8xf32> -> vector<256x8xf32>
    %40 = arith.addf %33, %39 : vector<256x8xf32>
    %41 = vector.extract_strided_slice %2 {offsets = [1, 2, 0], sizes = [16, 16, 4], strides = [1, 1, 1]} : vector<18x18x4xf32> to vector<16x16x4xf32>
    %42 = vector.shape_cast %41 : vector<16x16x4xf32> to vector<256x4xf32>
    %43 = arith.truncf %42 : vector<256x4xf32> to vector<256x4xbf16>
    %44 = vector.extract_strided_slice %3 {offsets = [5, 0, 0], sizes = [1, 4, 8], strides = [1, 1, 1]} : vector<9x4x8xbf16> to vector<1x4x8xbf16>
    %45 = vector.shape_cast %44 : vector<1x4x8xbf16> to vector<4x8xbf16>
    %cst_13 = arith.constant dense<0.000000e+00> : vector<256x8xf32>
    %46 = tpu.matmul %43, %45, %cst_13 {dimension_numbers = #tpu.dot_dimension_numbers<[1], [0], [0], [1], [0, 0, 1, 1], [], []>} : vector<256x4xbf16>, vector<4x8xbf16>, vector<256x8xf32> -> vector<256x8xf32>
    %47 = arith.addf %40, %46 : vector<256x8xf32>
    %48 = vector.extract_strided_slice %2 {offsets = [2, 0, 0], sizes = [16, 16, 4], strides = [1, 1, 1]} : vector<18x18x4xf32> to vector<16x16x4xf32>
    %49 = vector.shape_cast %48 : vector<16x16x4xf32> to vector<256x4xf32>
    %50 = arith.truncf %49 : vector<256x4xf32> to vector<256x4xbf16>
    %51 = vector.extract_strided_slice %3 {offsets = [6, 0, 0], sizes = [1, 4, 8], strides = [1, 1, 1]} : vector<9x4x8xbf16> to vector<1x4x8xbf16>
    %52 = vector.shape_cast %51 : vector<1x4x8xbf16> to vector<4x8xbf16>
    %cst_14 = arith.constant dense<0.000000e+00> : vector<256x8xf32>
    %53 = tpu.matmul %50, %52, %cst_14 {dimension_numbers = #tpu.dot_dimension_numbers<[1], [0], [0], [1], [0, 0, 1, 1], [], []>} : vector<256x4xbf16>, vector<4x8xbf16>, vector<256x8xf32> -> vector<256x8xf32>
    %54 = arith.addf %47, %53 : vector<256x8xf32>
    %55 = vector.extract_strided_slice %2 {offsets = [2, 1, 0], sizes = [16, 16, 4], strides = [1, 1, 1]} : vector<18x18x4xf32> to vector<16x16x4xf32>
    %56 = vector.shape_cast %55 : vector<16x16x4xf32> to vector<256x4xf32>
    %57 = arith.truncf %56 : vector<256x4xf32> to vector<256x4xbf16>
    %58 = vector.extract_strided_slice %3 {offsets = [7, 0, 0], sizes = [1, 4, 8], strides = [1, 1, 1]} : vector<9x4x8xbf16> to vector<1x4x8xbf16>
    %59 = vector.shape_cast %58 : vector<1x4x8xbf16> to vector<4x8xbf16>
    %cst_15 = arith.constant dense<0.000000e+00> : vector<256x8xf32>
    %60 = tpu.matmul %57, %59, %cst_15 {dimension_numbers = #tpu.dot_dimension_numbers<[1], [0], [0], [1], [0, 0, 1, 1], [], []>} : vector<256x4xbf16>, vector<4x8xbf16>, vector<256x8xf32> -> vector<256x8xf32>
    %61 = arith.addf %54, %60 : vector<256x8xf32>
    %62 = vector.extract_strided_slice %2 {offsets = [2, 2, 0], sizes = [16, 16, 4], strides = [1, 1, 1]} : vector<18x18x4xf32> to vector<16x16x4xf32>
    %63 = vector.shape_cast %62 : vector<16x16x4xf32> to vector<256x4xf32>
    %64 = arith.truncf %63 : vector<256x4xf32> to vector<256x4xbf16>
    %65 = vector.extract_strided_slice %3 {offsets = [8, 0, 0], sizes = [1, 4, 8], strides = [1, 1, 1]} : vector<9x4x8xbf16> to vector<1x4x8xbf16>
    %66 = vector.shape_cast %65 : vector<1x4x8xbf16> to vector<4x8xbf16>
    %cst_16 = arith.constant dense<0.000000e+00> : vector<256x8xf32>
    %67 = tpu.matmul %64, %66, %cst_16 {dimension_numbers = #tpu.dot_dimension_numbers<[1], [0], [0], [1], [0, 0, 1, 1], [], []>} : vector<256x4xbf16>, vector<4x8xbf16>, vector<256x8xf32> -> vector<256x8xf32>
    %68 = arith.addf %61, %67 : vector<256x8xf32>
    %69 = vector.broadcast %4 : vector<1x8xf32> to vector<256x8xf32>
    %70 = arith.addf %68, %69 : vector<256x8xf32>
    %cst_17 = arith.constant 0.000000e+00 : f32
    %71 = vector.broadcast %cst_17 : f32 to vector<256x8xf32>
    %72 = arith.maximumf %70, %71 : vector<256x8xf32>
    %73 = vector.shape_cast %72 : vector<256x8xf32> to vector<16x16x8xf32>
    %74 = arith.truncf %73 : vector<16x16x8xf32> to vector<16x16x8xbf16>
    %c0_18 = arith.constant 0 : index
    %c0_19 = arith.constant 0 : index
    %c0_20 = arith.constant 0 : index
    %c0_21 = arith.constant 0 : index
    %75 = vector.load %arg4[%c0_18, %c0_19, %c0_20, %c0_21] : memref<1x16x16x8xbf16, #tpu.memory_space<vmem>>, vector<1x16x16x8xbf16>
    %76 = vector.shape_cast %75 : vector<1x16x16x8xbf16> to vector<16x16x8xbf16>
    %77 = vector.shape_cast %74 : vector<16x16x8xbf16> to vector<1x16x16x8xbf16>
    tpu.vector_store %arg4[%c0_18, %c0_19, %c0_20, %c0_21], %77 {strides = array<i32>} : memref<1x16x16x8xbf16, #tpu.memory_space<vmem>>, vector<1x16x16x8xbf16>,
    return
  }
  func.func @transform_0(%arg0: i32) -> (i32, i32, i32, i32) {
    %c0_i32 = arith.constant 0 : i32
    %c0_i32_0 = arith.constant 0 : i32
    %c0_i32_1 = arith.constant 0 : i32
    %c0_i32_2 = arith.constant 0 : i32
    return %arg0, %c0_i32, %c0_i32_0, %c0_i32_1 : i32, i32, i32, i32
  }
  func.func @transform_1(%arg0: i32) -> (i32, i32, i32) {
    %c0_i32 = arith.constant 0 : i32
    %c0_i32_0 = arith.constant 0 : i32
    %c0_i32_1 = arith.constant 0 : i32
    %c0_i32_2 = arith.constant 0 : i32
    return %c0_i32, %c0_i32_0, %c0_i32_1 : i32, i32, i32
  }
  func.func @transform_2(%arg0: i32) -> (i32, i32) {
    %c0_i32 = arith.constant 0 : i32
    %c0_i32_0 = arith.constant 0 : i32
    %c0_i32_1 = arith.constant 0 : i32
    return %c0_i32, %c0_i32_0 : i32, i32
  }
  func.func @transform_3(%arg0: i32) -> (i32, i32, i32, i32) {
    %c0_i32 = arith.constant 0 : i32
    %c0_i32_0 = arith.constant 0 : i32
    %c0_i32_1 = arith.constant 0 : i32
    %c0_i32_2 = arith.constant 0 : i32
    return %arg0, %c0_i32, %c0_i32_0, %c0_i32_1 : i32, i32, i32, i32
  }
}

</mosaic_0001>

<bundles_post_ra>
// kernel: tpu_custom_call.1
= control target key start
LH: loop header
LB: loop body
LE: loop exit
PB: predicated region body
PF: predicated region fallthrough
CT: control target
= control target key end

     0   :  { %s3840_s12 = smov 0   ;;  %s4832_s0 = inlined_call_operand.vmem [shape: bf16[2,18,18,4], index: 0, kind: input, shape index: {}]   ;;  %s4833_s1 = inlined_call_operand.vmem [shape: bf16[9,4,8], index: 1, kind: input, shape index: {}]   ;;  %s4834_s2 = inlined_call_operand.vmem [shape: f32[1,8], index: 2, kind: input, shape index: {}]   ;;  %s4835_s3 = inlined_call_operand.vmem [shape: bf16[2,16,16,8], index: 3, kind: output, shape index: {}]  }
   0x1 LB: > { %s2802_s13 = sadd.s32 4294967295, %s3818_s12   ;;  %p2806_p0 = scmp.ge.s32.totalorder %s3818_s12, 1  ;;  %s3818_s12 = sphi %s3840_s12, %s13_s12  }
   0x2   : > { %p137_p1 = scmp.lt.s32.totalorder %s3818_s12, 3 }
   0x4   : > { %p138_p2 = pnand %p2806_p0, %p137_p1 }
   0x6   : > { %141 = sbr.rel (%p138_p2) target bundleno = 535 (0x217), region = 32 }
   0xd   : > { %v281_v0 = vld [vmem:[%s4833_s1 + $0x2] sm:$0x3]  ;;  %vm532_vm0 = vcmask 1041408   ;;  %v3854_v1 = vld [vmem:[%s4833_s1 + $0x8] sm:$0x3]  ;;  %p161_p3 = scmp.lt.s32.totalorder %s2802_s13, 1 }
   0xe   : > { %3757 = vmatprep.subr.msk.bf16.mxu1 %vm532_vm0, %v281_v0  ;;  %3761 = vmatprep.subr.msk.bf16.mxu0 %vm532_vm0, %v3854_v1  ;;  %v534_v2 = vsel %vm532_vm0, %v281_v0, 0  ;;  %v3862_v3 = vsel %vm532_vm0, %v3854_v1, 0  ;;  %v280_v4 = vld [vmem:[%s4833_s1] sm:$0x3]  ;;  %v285_v5 = vld [vmem:[%s4833_s1 + $0xa] sm:$0x3] }
   0xf   : > { %4874 = vst [vmem:[#allocation2_spill] sm:$0xff] %v3862_v3  ;;  %3194 = vmatpush3.bf16.msra.mxu1 %v534_v2  ;;  %3330 = vmatpush3.bf16.msra.mxu0 %v3862_v3  ;;  %s4916_s13 = smov (!%p161_p3, %s2802_s13), 1  ;;  %vm354_vm1 = vcmask 1046528   ;;  %vm483_vm2 = vcmask 31744   ;;  %v746_v37 = vsel %vm532_vm0, %v280_v4, 0  ;;  %v1704_v43 = vsel %vm532_vm0, %v285_v5, 0 }
  0x10   : > { %3758 = vmatprep.subr.msk.bf16.mxu1 %vm532_vm0, %v280_v4  ;;  %3763 = vmatprep.subr.msk.bf16.mxu0 %vm532_vm0, %v285_v5  ;;  %s3767_s22 = smul.u32 216, %s4916_s13  ;;  %v3950_v44 = vld [vmem:[%s4833_s1 + $0x4] sm:$0x3]  ;;  %v3994_v2 = vld [vmem:[%s4833_s1 + $0xc] sm:$0x3]  ;;  %vm909_vm3 = vcmask 1045504  }
  0x11   : > { %s3007_s11 = sshll.u32 %s4916_s13, 7  ;;  %vm2714_vm4 = vcmask 60416  }
  0x12   : > { %s3879_s25 = scalar_lea.vmem %s4832_s0, %s3767_s22  ;;  %s4728_s16 = scalar_lea.vmem %s4835_s3, %s3007_s11 }
  0x13   : > { %v3882_v6 = vld [vmem:[%s3879_s25] sm:$0xff]   ;;  %v3885_v7 = vld [vmem:[%s3879_s25 + $0x8] sm:$0x1]  ;;  %v3888_v8 = vld [vmem:[%s3879_s25 + $0xc] sm:$0xff]  }
  0x14   : > { %v4838_v9 = vunpack.c.l.bf16 %v3882_v6  ;;  %v4837_v10 = vunpack.c.h.bf16 %v3882_v6  ;;  %v4836_v11 = vunpack.c.l.bf16 %v3885_v7  ;;  %v3894_v12 = vld [vmem:[%s3879_s25 + $0x14] sm:$0x1]  ;;  %v229_v13 = vunpack.c.l.bf16 %v3888_v8  ;;  %v3898_v14 = vld [vmem:[%s3879_s25 + $0x18] sm:$0xff]   ;;  %v3914_v23 = vld [vmem:[%s3879_s25 + $0x20] sm:$0x1] }
  0x15   : > { %v230_v15 = vunpack.c.h.bf16 %v3888_v8  ;;  %v231_v16 = vunpack.c.l.bf16 %v3894_v12  ;;  %v232_v20 = vunpack.c.l.bf16 %v3898_v14  ;;  %v3921_v27 = vld [vmem:[%s3879_s25 + $0x24] sm:$0xff]   ;;  %v233_v31 = vunpack.c.h.bf16 %v3898_v14  ;;  %v3930_v34 = vld [vmem:[%s3879_s25 + $0x2c] sm:$0x1]  ;;  %v3933_v35 = vld [vmem:[%s3879_s25 + $0x30] sm:$0xff]  }
  0x16   : > { %v355_v17 = vrot.slane %v4838_v9, 1  ;;  %v356_v18 = vrot.slane %v4837_v10, 1  ;;  %v358_v19 = vrot.slane %v4836_v11, 1  ;;  %v360_v21 = vrot.slane %v229_v13, 1  ;;  %v3940_v40 = vld [vmem:[%s3879_s25 + $0x38] sm:$0x1] }
  0x17   : > { %v361_v22 = vrot.slane %v230_v15, 1  ;;  %v363_v26 = vrot.slane %v231_v16, 1  ;;  %v234_v32 = vunpack.c.l.bf16 %v3914_v23  ;;  %v365_v33 = vrot.slane %v232_v20, 1  ;;  %v3961_v49 = vld [vmem:[%s3879_s25 + $0x3c] sm:$0xff]   ;;  %v3968_v54 = vld [vmem:[%s3879_s25 + $0x44] sm:$0x1] }
  0x18   : > { %v357_v24 = vsel %vm354_vm1, %v355_v17, %v356_v18  ;;  %v359_v25 = vsel %vm354_vm1, %v356_v18, %v358_v19  ;;  %v235_v38 = vunpack.c.l.bf16 %v3921_v27  ;;  %v236_v39 = vunpack.c.h.bf16 %v3921_v27  ;;  %v3971_v55 = vld [vmem:[%s3879_s25 + $0x48] sm:$0xff]   ;;  %v3989_v0 = vld [vmem:[%s3879_s25 + $0x50] sm:$0x1]  ;;  %v4005_v19 = vld [vmem:[%s3879_s25 + $0x54] sm:$0xff]  }
  0x19   : > { %v467_v28 = vpack.c.bf16 %v359_v25, %v357_v24  ;;  %v362_v29 = vsel %vm354_vm1, %v360_v21, %v361_v22  ;;  %v364_v30 = vsel %vm354_vm1, %v361_v22, %v363_v26  ;;  %v366_v41 = vrot.slane %v233_v31, 1  ;;  %v4014_v26 = vld [vmem:[%s3879_s25 + $0x5c] sm:$0x1] }
  0x1a   : > { %v468_v36 = vpack.c.bf16 %v364_v30, %v362_v29  ;;  %v368_v42 = vrot.slane %v234_v32, 1  ;;  %v237_v45 = vunpack.c.l.bf16 %v3930_v34  ;;  %v370_v46 = vrot.slane %v235_v38, 1 }
  0x1b   : > { %3195 = vmatprep.mubr.msk.bf16.mxu1 %vm483_vm2, %v467_v28  ;;  %v371_v47 = vrot.slane %v236_v39, 1  ;;  %v238_v48 = vunpack.c.l.bf16 %v3933_v35  ;;  %v367_v50 = vsel %vm354_vm1, %v365_v33, %v366_v41  ;;  %v239_v52 = vunpack.c.h.bf16 %v3933_v35 }
  0x1c   : > { %3331 = vmatprep.mubr.msk.bf16.mxu0 %vm483_vm2, %v468_v36  ;;  %3196 = vmatmul.mubr.msk.bf16.vlgmr.msra.gmra.mrb[0].mxu1 %vm483_vm2, %v468_v36  ;;  %v369_v51 = vsel %vm354_vm1, %v366_v41, %v368_v42  ;;  %v240_v53 = vunpack.c.l.bf16 %v3940_v40  ;;  %v373_v58 = vrot.slane %v237_v45, 1  ;;  %v241_v62 = vunpack.c.l.bf16 %v3961_v49 }
  0x1d   : > { %3228 = vmatpush3.bf16.msra.mxu1 %v746_v37  ;;  %v3973_v56 = vpack.c.bf16 %v369_v51, %v367_v50  ;;  %v372_v57 = vsel %vm354_vm1, %v370_v46, %v371_v47  ;;  %v375_v59 = vrot.slane %v238_v48, 1  ;;  %v376_v60 = vrot.slane %v239_v52, 1  ;;  %v4041_v51 = vld [vmem:[%s3879_s25 + $0x60] sm:$0xff]  }
  0x1e   : > { %3759 = vmatprep.subr.msk.bf16.mxu1 %vm532_vm0, %v3950_v44  ;;  %v378_v61 = vrot.slane %v240_v53, 1  ;;  %v242_v63 = vunpack.c.h.bf16 %v3961_v49  ;;  %v374_v4 = vsel %vm354_vm1, %v371_v47, %v373_v58  ;;  %v4854_v5 = vunpack.c.l.bf16 %v3968_v54  ;;  %v4048_v58 = vld [vmem:[%s3879_s25 + $0x68] sm:$0x1] }
  0x1f   : > { %3332 = vmatmul.mubr.msk.bf16.vlgmr.msra.gmra.mrb[0].mxu0 %vm483_vm2, %v3973_v56  ;;  %3199 = vmatprep.mubr.msk.bf16.mxu1 %vm483_vm2, %v3973_v56  ;;  %v4853_v17 = vunpack.c.l.bf16 %v3971_v55  ;;  %v4848_v18 = vunpack.c.h.bf16 %v3971_v55  ;;  %v4007_v21 = vpack.c.bf16 %v374_v4, %v372_v57  ;;  %v377_v22 = vsel %vm354_vm1, %v375_v59, %v376_v60 }
  0x20   : > { %3364 = vmatpush3.bf16.msra.mxu0 %v1704_v43  ;;  %v379_v24 = vsel %vm354_vm1, %v376_v60, %v378_v61  ;;  %v380_v25 = vrot.slane %v241_v62, 1  ;;  %v381_v29 = vrot.slane %v242_v63, 1  ;;  %v383_v30 = vrot.slane %v4854_v5, 1 }
  0x21   : > { %v4016_v28 = vpack.c.bf16 %v379_v24, %v377_v22  ;;  %v4845_v33 = vunpack.c.l.bf16 %v3989_v0  ;;  %3764 = vmatprep.subr.msk.bf16.mxu0 %vm532_vm0, %v3994_v2  ;;  %3335 = vmatprep.mubr.msk.bf16.mxu0 %vm483_vm2, %v4007_v21  ;;  %v385_v36 = vrot.slane %v4853_v17, 1  ;;  %v386_v37 = vrot.slane %v4848_v18, 1 }
  0x22   : > { %v4844_v41 = vunpack.c.l.bf16 %v4005_v19  ;;  %v4843_v42 = vunpack.c.h.bf16 %v4005_v19  ;;  %v382_v43 = vsel %vm354_vm1, %v380_v25, %v381_v29  ;;  %v384_v46 = vsel %vm354_vm1, %v381_v29, %v383_v30  ;;  %v4066_v30 = vld [vmem:[%s3879_s25 + $0x6c] sm:$0xff]  }
  0x23   : > { %v388_v47 = vrot.slane %v4845_v33, 1  ;;  %v4839_v50 = vunpack.c.l.bf16 %v4014_v26  ;;  %v4045_v57 = vpack.c.bf16 %v384_v46, %v382_v43  ;;  %v4842_v4 = vunpack.c.l.bf16 %v4041_v51 }
  0x24   : > { %3200 = vmatmul.mubr.msk.bf16.gmra.mrb[4].mxu1 %vm483_vm2, %v4007_v21  ;;  %v390_v59 = vrot.slane %v4844_v41, 1  ;;  %v391_v60 = vrot.slane %v4843_v42, 1  ;;  %v387_v22 = vsel %vm354_vm1, %v385_v36, %v386_v37  ;;  %v4841_v25 = vunpack.c.h.bf16 %v4041_v51  ;;  %v4073_v36 = vld [vmem:[%s3879_s25 + $0x74] sm:$0x1] }
  0x25   : > { %3203 = vmatprep.mubr.msk.bf16.mxu1 %vm483_vm2, %v4016_v28  ;;  %v393_v61 = vrot.slane %v4839_v50, 1  ;;  %v389_v24 = vsel %vm354_vm1, %v386_v37, %v388_v47  ;;  %v4840_v29 = vunpack.c.l.bf16 %v4048_v58  ;;  %v915_v43 = vrot.slane %v229_v13, 2  ;;  %v4084_v50 = vld [vmem:[%s3879_s25 + $0x78] sm:$0xff]   ;;  %v4087_v13 = vld [vmem:[%s3879_s25 + $0x80] sm:$0x1] }
  0x26   : > { %v392_v46 = vsel %vm354_vm1, %v390_v59, %v391_v60  ;;  %v916_v37 = vrot.slane %v230_v15, 2  ;;  %v918_v47 = vrot.slane %v231_v16, 2  ;;  %v4079_v10 = vpack.c.bf16 %v389_v24, %v387_v22 }
  0x27   : > { %3336 = vmatmul.mubr.msk.bf16.gmra.mrb[4].mxu0 %vm483_vm2, %v4016_v28  ;;  %v394_v11 = vsel %vm354_vm1, %v391_v60, %v393_v61  ;;  %v395_v9 = vrot.slane %v4842_v4, 1  ;;  %v396_v59 = vrot.slane %v4841_v25, 1  ;;  %v398_v15 = vrot.slane %v4840_v29, 1 }
  0x28   : > { %3339 = vmatprep.mubr.msk.bf16.mxu0 %vm483_vm2, %v4045_v57  ;;  %v4847_v12 = vunpack.c.l.bf16 %v4066_v30  ;;  %v4846_v16 = vunpack.c.h.bf16 %v4066_v30  ;;  %v4099_v60 = vpack.c.bf16 %v394_v11, %v392_v46  ;;  %v4852_v61 = vunpack.c.l.bf16 %v4073_v36 }
  0x29   : > { %v920_v22 = vrot.slane %v232_v20, 2  ;;  %v4850_v24 = vunpack.c.l.bf16 %v4084_v50  ;;  %v4849_v29 = vunpack.c.h.bf16 %v4084_v50  ;;  %v4851_v25 = vunpack.c.l.bf16 %v4087_v13 }
  0x2a   : > { %v921_v4 = vrot.slane %v233_v31, 2  ;;  %v923_v42 = vrot.slane %v234_v32, 2  ;;  %v917_v11 = vsel %vm909_vm3, %v915_v43, %v916_v37  ;;  %v919_v46 = vsel %vm909_vm3, %v916_v37, %v918_v47  ;;  %v4122_v31 = vld [vmem:[%s3879_s25 + $0x84] sm:$0xff]   ;;  %v4125_v32 = vld [vmem:[%s3879_s25 + $0x8c] sm:$0x1] }
  0x2b   : > { %v397_v20 = vsel %vm354_vm1, %v395_v9, %v396_v59  ;;  %v399_v41 = vsel %vm354_vm1, %v396_v59, %v398_v15  ;;  %v400_v33 = vrot.slane %v4847_v12, 1  ;;  %v401_v23 = vrot.slane %v4846_v16, 1  ;;  %v4140_v15 = vld [vmem:[%s3879_s25 + $0x90] sm:$0xff]  }
  0x2c   : > { %3204 = vmatmul.mubr.msk.bf16.gmra.mrb[8].mxu1 %vm483_vm2, %v4045_v57  ;;  %v403_v43 = vrot.slane %v4852_v61, 1  ;;  %v4131_v9 = vpack.c.bf16 %v919_v46, %v917_v11  ;;  %v405_v37 = vrot.slane %v4850_v24, 1  ;;  %v406_v47 = vrot.slane %v4849_v29, 1  ;;  %v4148_v46 = vld [vmem:[%s3879_s25 + $0x98] sm:$0x1] }
  0x2d   : > { %3207 = vmatprep.mubr.msk.bf16.mxu1 %vm483_vm2, %v4079_v10  ;;  %v408_v59 = vrot.slane %v4851_v25, 1  ;;  %v4142_v16 = vpack.c.bf16 %v399_v41, %v397_v20  ;;  %v4860_v12 = vunpack.c.l.bf16 %v4122_v31  ;;  %v4859_v18 = vunpack.c.h.bf16 %v4122_v31 }
  0x2e   : > { %v4855_v11 = vunpack.c.l.bf16 %v4125_v32  ;;  %v402_v29 = vsel %vm354_vm1, %v400_v33, %v401_v23  ;;  %v922_v24 = vsel %vm909_vm3, %v920_v22, %v921_v4  ;;  %v924_v25 = vsel %vm909_vm3, %v921_v4, %v923_v42 }
  0x2f   : > { %3340 = vmatmul.mubr.msk.bf16.gmra.mrb[8].mxu0 %vm483_vm2, %v4079_v10  ;;  %v925_v41 = vrot.slane %v235_v38, 2  ;;  %v404_v20 = vsel %vm354_vm1, %v401_v23, %v403_v43  ;;  %v926_v61 = vrot.slane %v236_v39, 2  ;;  %v4858_v17 = vunpack.c.l.bf16 %v4140_v15 }
  0x30   : > { %3343 = vmatprep.mubr.msk.bf16.mxu0 %vm483_vm2, %v4099_v60  ;;  %v4856_v5 = vunpack.c.h.bf16 %v4140_v15  ;;  %v407_v33 = vsel %vm354_vm1, %v405_v37, %v406_v47  ;;  %v409_v42 = vsel %vm354_vm1, %v406_v47, %v408_v59  ;;  %v928_v38 = vrot.slane %v237_v45, 2 }
  0x31   : > { %v4857_v4 = vunpack.c.l.bf16 %v4148_v46  ;;  %v410_v22 = vrot.slane %v4860_v12, 1  ;;  %v411_v39 = vrot.slane %v4859_v18, 1  ;;  %v413_v23 = vrot.slane %v4855_v11, 1  ;;  %v4191_v11 = vld [vmem:[%s3879_s25 + $0x9c] sm:$0xff]  }
  0x32   : > { %v4177_v43 = vpack.c.bf16 %v404_v20, %v402_v29  ;;  %v4179_v37 = vpack.c.bf16 %v924_v25, %v922_v24  ;;  %v4183_v34 = vpack.c.bf16 %v409_v42, %v407_v33  ;;  %v927_v45 = vsel %vm909_vm3, %v925_v41, %v926_v61  ;;  %v4201_v41 = vld [vmem:[%s3879_s25 + $0xa4] sm:$0x1] }
  0x33   : > { %v415_v47 = vrot.slane %v4858_v17, 1  ;;  %v416_v59 = vrot.slane %v4856_v5, 1  ;;  %v929_v25 = vsel %vm909_vm3, %v926_v61, %v928_v38  ;;  %v930_v29 = vrot.slane %v238_v48, 2  ;;  %v4210_v38 = vld [vmem:[%s3879_s25 + $0xa8] sm:$0xff]   ;;  %v4213_v48 = vld [vmem:[%s3879_s25 + $0xb0] sm:$0x1] }
  0x34   : > { %3208 = vmatmul.mubr.msk.bf16.gmra.mrb[12].mxu1 %vm483_vm2, %v4099_v60  ;;  %v931_v24 = vrot.slane %v239_v52, 2  ;;  %v418_v20 = vrot.slane %v4857_v4, 1  ;;  %v412_v33 = vsel %vm354_vm1, %v410_v22, %v411_v39  ;;  %v414_v42 = vsel %vm354_vm1, %v411_v39, %v413_v23 }
  0x35   : > { %3211 = vmatprep.mubr.msk.bf16.mxu1 %vm483_vm2, %v4142_v16  ;;  %v933_v5 = vrot.slane %v240_v53, 2  ;;  %v935_v61 = vrot.slane %v241_v62, 2  ;;  %v936_v52 = vrot.slane %v242_v63, 2  ;;  %v4875_v22 = vunpack.c.l.bf16 %v3968_v54 }
  0x36   : > { %v4866_v39 = vunpack.c.l.bf16 %v4191_v11  ;;  %v4865_v40 = vunpack.c.h.bf16 %v4191_v11  ;;  %v1904_v53 = vsel %vm532_vm0, %v3994_v2, 0  ;;  %v4227_v62 = vpack.c.bf16 %v929_v25, %v927_v45 }
  0x37   : > { %3344 = vmatmul.mubr.msk.bf16.gmra.mrb[12].mxu0 %vm483_vm2, %v4142_v16  ;;  %v938_v4 = vrot.slane %v4875_v22, 2  ;;  %v417_v23 = vsel %vm354_vm1, %v415_v47, %v416_v59  ;;  %v4863_v17 = vunpack.c.l.bf16 %v4201_v41  ;;  %v419_v63 = vsel %vm354_vm1, %v416_v59, %v418_v20  ;;  %v4242_v47 = vld [vmem:[%s4833_s1 + $0xe] sm:$0x3] }
  0x38   : > { %3365 = vmatprep.mubr.msk.bf16.mxu0 %vm483_vm2, %v4131_v9  ;;  %v4861_v54 = vunpack.c.l.bf16 %v4210_v38  ;;  %v4862_v22 = vunpack.c.h.bf16 %v4210_v38  ;;  %v4864_v18 = vunpack.c.l.bf16 %v4213_v48  ;;  %v4235_v12 = vpack.c.bf16 %v414_v42, %v412_v33 }
  0x39   : > { %v932_v2 = vsel %vm909_vm3, %v930_v29, %v931_v24  ;;  %v934_v45 = vsel %vm909_vm3, %v931_v24, %v933_v5  ;;  %v937_v59 = vsel %vm909_vm3, %v935_v61, %v936_v52  ;;  %v939_v25 = vsel %vm909_vm3, %v936_v52, %v938_v4  ;;  %v4267_v52 = vld [vmem:[%s3879_s25 + $0xb4] sm:$0xff]  }
  0x3a   : > { %4876 = vst [vmem:[#allocation3_spill] sm:$0xff] %v4235_v12  ;;  %v420_v20 = vrot.slane %v4866_v39, 1  ;;  %v421_v29 = vrot.slane %v4865_v40, 1  ;;  %v4254_v5 = vpack.c.bf16 %v419_v63, %v417_v23  ;;  %v423_v24 = vrot.slane %v4863_v17, 1 }
  0x3b   : > { %v4258_v33 = vpack.c.bf16 %v934_v45, %v932_v2  ;;  %v425_v4 = vrot.slane %v4861_v54, 1  ;;  %v426_v42 = vrot.slane %v4862_v22, 1  ;;  %v428_v61 = vrot.slane %v4864_v18, 1 }
  0x3c   : > { %3212 = vmatmul.mubr.msk.bf16.gmra.mrb[16].mxu1 %vm483_vm2, %v4177_v43  ;;  %v4274_v23 = vpack.c.bf16 %v939_v25, %v937_v59  ;;  %v4877_v63 = vunpack.c.l.bf16 %v3971_v55  ;;  %v4878_v45 = vunpack.c.h.bf16 %v3971_v55  ;;  %v4879_v22 = vunpack.c.l.bf16 %v3989_v0 }
  0x3d   : > { %3215 = vmatprep.mubr.msk.bf16.mxu1 %vm483_vm2, %v4183_v34  ;;  %v422_v18 = vsel %vm354_vm1, %v420_v20, %v421_v29  ;;  %v4880_v40 = vunpack.c.l.bf16 %v4005_v19  ;;  %v4881_v59 = vunpack.c.h.bf16 %v4005_v19  ;;  %v4882_v3 = vunpack.c.l.bf16 %v4014_v26 }
  0x3e   : > { %v940_v2 = vrot.slane %v4877_v63, 2  ;;  %v941_v54 = vrot.slane %v4878_v45, 2  ;;  %v943_v17 = vrot.slane %v4879_v22, 2  ;;  %v424_v0 = vsel %vm354_vm1, %v421_v29, %v423_v24 }
  0x3f   : > { %3366 = vmatmul.mubr.msk.bf16.vlgmr.msra.gmra.mrb[0].mxu0 %vm483_vm2, %v4179_v37  ;;  %v945_v39 = vrot.slane %v4880_v40, 2  ;;  %v946_v25 = vrot.slane %v4881_v59, 2  ;;  %v948_v63 = vrot.slane %v4882_v3, 2  ;;  %v4871_v22 = vunpack.c.l.bf16 %v4267_v52 }
  0x40   : > { %3398 = vmatpush3.bf16.msra.mxu0 %v1904_v53  ;;  %3369 = vmatprep.mubr.msk.bf16.mxu0 %vm483_vm2, %v4227_v62  ;;  %v4270_v53 = vld [vmem:[%s3879_s25 + $0xbc] sm:$0x1]  ;;  %v4870_v45 = vunpack.c.h.bf16 %v4267_v52  ;;  %v429_v40 = vsel %vm354_vm1, %v426_v42, %v428_v61  ;;  %v942_v59 = vsel %vm909_vm3, %v940_v2, %v941_v54  ;;  %v4302_v3 = vpack.c.bf16 %v424_v0, %v422_v18 }
  0x41   : > { %3765 = vmatprep.subr.msk.bf16.mxu0 %vm532_vm0, %v4242_v47  ;;  %v944_v26 = vsel %vm909_vm3, %v941_v54, %v943_v17  ;;  %v947_v29 = vsel %vm909_vm3, %v945_v39, %v946_v25  ;;  %v949_v24 = vsel %vm909_vm3, %v946_v25, %v948_v63  ;;  %v4884_v18 = vunpack.c.l.bf16 %v4270_v53 }
  0x42   : > { %v4319_v17 = vpack.c.bf16 %v944_v26, %v942_v59  ;;  %v4321_v39 = vpack.c.bf16 %v949_v24, %v947_v29  ;;  %v4885_v54 = vunpack.c.l.bf16 %v4041_v51  ;;  %v4886_v63 = vunpack.c.h.bf16 %v4041_v51 }
  0x43   : > { %v433_v61 = vrot.slane %v4884_v18, 1  ;;  %v4888_v59 = vunpack.c.l.bf16 %v4066_v30  ;;  %v4889_v29 = vunpack.c.h.bf16 %v4066_v30 }
  0x44   : > { %3216 = vmatmul.mubr.msk.bf16.gmra.mrb[20].mxu1 %vm483_vm2, %v4235_v12  ;;  %v427_v12 = vsel %vm354_vm1, %v425_v4, %v426_v42  ;;  %v430_v4 = vrot.slane %v4871_v22, 1  ;;  %v431_v42 = vrot.slane %v4870_v45, 1  ;;  %v951_v0 = vrot.slane %v4886_v63, 2 }
  0x45   : > { %3219 = vmatprep.mubr.msk.bf16.mxu1 %vm483_vm2, %v4254_v5  ;;  %v4309_v20 = vpack.c.bf16 %v429_v40, %v427_v12  ;;  %v950_v12 = vrot.slane %v4885_v54, 2  ;;  %v4887_v40 = vunpack.c.l.bf16 %v4048_v58  ;;  %v955_v26 = vrot.slane %v4888_v59, 2 }
  0x46   : > { %v432_v2 = vsel %vm354_vm1, %v430_v4, %v431_v42  ;;  %v434_v25 = vsel %vm354_vm1, %v431_v42, %v433_v61  ;;  %v956_v24 = vrot.slane %v4889_v29, 2  ;;  %v4890_v54 = vunpack.c.l.bf16 %v4073_v36 }
  0x47   : > { %3370 = vmatmul.mubr.msk.bf16.gmra.mrb[4].mxu0 %vm483_vm2, %v4258_v33  ;;  %4883 = vst [vmem:[#allocation4_spill] sm:$0xff] %v4309_v20  ;;  %v953_v18 = vrot.slane %v4887_v40, 2  ;;  %v4891_v22 = vunpack.c.l.bf16 %v3882_v6  ;;  %v4892_v42 = vunpack.c.h.bf16 %v3882_v6  ;;  %v4893_v63 = vunpack.c.l.bf16 %v3885_v7 }
  0x48   : > { %3373 = vmatprep.mubr.msk.bf16.mxu0 %vm483_vm2, %v4274_v23  ;;  %v958_v45 = vrot.slane %v4890_v54, 2  ;;  %v4347_v58 = vpack.c.bf16 %v434_v25, %v432_v2  ;;  %v952_v36 = vsel %vm909_vm3, %v950_v12, %v951_v0  ;;  %v4894_v2 = vunpack.c.l.bf16 %v4084_v50 }
  0x49   : > { %v910_v4 = vrot.slane %v4891_v22, 2  ;;  %v911_v61 = vrot.slane %v4892_v42, 2  ;;  %v954_v40 = vsel %vm909_vm3, %v951_v0, %v953_v18  ;;  %v957_v22 = vsel %vm909_vm3, %v955_v26, %v956_v24 }
  0x4a   : > { %v959_v59 = vsel %vm909_vm3, %v956_v24, %v958_v45  ;;  %v4360_v7 = vpack.c.bf16 %v954_v40, %v952_v36  ;;  %v960_v25 = vrot.slane %v4894_v2, 2  ;;  %v4895_v45 = vunpack.c.h.bf16 %v4084_v50 }
  0x4b   : > { %v4356_v29 = vsel %vm909_vm3, %v910_v4, %v911_v61  ;;  %v4369_v12 = vpack.c.bf16 %v959_v59, %v957_v22  ;;  %v4896_v18 = vunpack.c.l.bf16 %v4087_v13  ;;  %v4897_v4 = vunpack.c.l.bf16 %v4122_v31 }
  0x4c   : > { %3220 = vmatmul.mubr.msk.bf16.gmra.mrb[24].mxu1 %vm483_vm2, %v4302_v3  ;;  %v961_v0 = vrot.slane %v4895_v45, 2  ;;  %v1087_v40 = vsel %vm532_vm0, %v3950_v44, 0  ;;  %v4900_v44 = vunpack.c.l.bf16 %v4140_v15 }
  0x4d   : > { %3223 = vmatprep.mubr.msk.bf16.mxu1 %vm483_vm2, %v4309_v20  ;;  %v913_v20 = vrot.slane %v4893_v63, 2  ;;  %v963_v26 = vrot.slane %v4896_v18, 2  ;;  %v965_v42 = vrot.slane %v4897_v4, 2  ;;  %v4899_v63 = vunpack.c.l.bf16 %v4125_v32  ;;  %v4396_v32 = vld [vmem:[%s4833_s1 + $0x6] sm:$0x3] }
  0x4e   : > { %v962_v13 = vsel %vm909_vm3, %v960_v25, %v961_v0  ;;  %v970_v45 = vrot.slane %v4900_v44, 2 }
  0x4f   : > { %3374 = vmatmul.mubr.msk.bf16.gmra.mrb[8].mxu0 %vm483_vm2, %v4319_v17  ;;  %v4365_v54 = vsel %vm909_vm3, %v911_v61, %v913_v20  ;;  %v4898_v20 = vunpack.c.h.bf16 %v4122_v31  ;;  %v964_v36 = vsel %vm909_vm3, %v961_v0, %v963_v26  ;;  %v4901_v0 = vunpack.c.h.bf16 %v4140_v15 }
  0x50   : > { %3377 = vmatprep.mubr.msk.bf16.mxu0 %vm483_vm2, %v4321_v39  ;;  %v1022_v24 = vpack.c.bf16 %v4365_v54, %v4356_v29  ;;  %v4400_v2 = vpack.c.bf16 %v964_v36, %v962_v13  ;;  %v4902_v26 = vunpack.c.l.bf16 %v4148_v46  ;;  %v225_v54 = vld [vmem:[%s3879_s25 + $0xd4] sm:$0x1] }
  0x51   : > { %v966_v61 = vrot.slane %v4898_v20, 2  ;;  %v971_v18 = vrot.slane %v4901_v0, 2  ;;  %v4907_v0 = vunpack.c.h.bf16 %v4210_v38 }
  0x52   : > { %v973_v4 = vrot.slane %v4902_v26, 2 }
  0x53   : > { %v967_v22 = vsel %vm909_vm3, %v965_v42, %v966_v61  ;;  %v4903_v42 = vunpack.c.l.bf16 %v4191_v11  ;;  %v972_v46 = vsel %vm909_vm3, %v970_v45, %v971_v18  ;;  %v981_v26 = vrot.slane %v4907_v0, 2 }
  0x54   : > { %3224 = vmatmul.mubr.msk.bf16.gmra.mrb[28].mxu1 %vm483_vm2, %v4347_v58  ;;  %v974_v36 = vsel %vm909_vm3, %v971_v18, %v973_v4  ;;  %v4908_v18 = vunpack.c.l.bf16 %v4213_v48 }
  0x55   : > { %3229 = vmatprep.mubr.msk.bf16.mxu1 %vm483_vm2, %v3882_v6  ;;  %v968_v6 = vrot.slane %v4899_v63, 2  ;;  %v975_v20 = vrot.slane %v4903_v42, 2  ;;  %v4909_v42 = vunpack.c.l.bf16 %v4267_v52 }
  0x56   : > { %v983_v4 = vrot.slane %v4908_v18, 2 }
  0x57   : > { %3378 = vmatmul.mubr.msk.bf16.gmra.mrb[12].mxu0 %vm483_vm2, %v4360_v7  ;;  %v969_v59 = vsel %vm909_vm3, %v966_v61, %v968_v6  ;;  %v4904_v61 = vunpack.c.h.bf16 %v4191_v11  ;;  %v4905_v6 = vunpack.c.l.bf16 %v4201_v41 }
  0x58   : > { %3381 = vmatprep.mubr.msk.bf16.mxu0 %vm483_vm2, %v4369_v12  ;;  %v4404_v25 = vpack.c.bf16 %v969_v59, %v967_v22  ;;  %v4430_v22 = vpack.c.bf16 %v974_v36, %v972_v46  ;;  %v4906_v59 = vunpack.c.l.bf16 %v4210_v38  ;;  %v4449_v46 = vld [vmem:[%s3879_s25 + $0xc0] sm:$0xff]   ;;  %v222_v36 = vld [vmem:[%s3879_s25 + $0xc8] sm:$0x1]  ;;  %v984_v48 = vsel %vm909_vm3, %v981_v26, %v983_v4 }
  0x59   : > { %v976_v63 = vrot.slane %v4904_v61, 2  ;;  %v978_v13 = vrot.slane %v4905_v6, 2  ;;  %v4910_v61 = vunpack.c.h.bf16 %v4267_v52  ;;  %v4911_v6 = vunpack.c.l.bf16 %v4270_v53 }
  0x5a   : > { %v980_v44 = vrot.slane %v4906_v59, 2  ;;  %v275_v59 = vunpack.c.h.bf16 %v4449_v46  ;;  %v276_v0 = vunpack.c.l.bf16 %v222_v36 }
  0x5b   : > { %v979_v41 = vsel %vm909_vm3, %v976_v63, %v978_v13  ;;  %v988_v13 = vrot.slane %v4911_v6, 2 }
  0x5c   : > { %3230 = vmatmul.mubr.msk.bf16.vlgmr.msra.gmra.mrb[0].mxu1 %vm483_vm2, %v3888_v8  ;;  %v1693_v4 = vrot.slane %v275_v59, 2  ;;  %v1488_v36 = vrot.slane %v276_v0, 1 }
  0x5d   : > { %3262 = vmatpush3.bf16.msra.mxu1 %v1087_v40  ;;  %3233 = vmatprep.mubr.msk.bf16.mxu1 %vm483_vm2, %v3898_v14  ;;  %v977_v40 = vsel %vm909_vm3, %v975_v20, %v976_v63  ;;  %v985_v20 = vrot.slane %v4909_v42, 2  ;;  %v986_v63 = vrot.slane %v4910_v61, 2  ;;  %v1695_v61 = vrot.slane %v276_v0, 2 }
  0x5e   : > { %3760 = vmatprep.subr.msk.bf16.mxu1 %vm532_vm0, %v4396_v32  ;;  %v4438_v45 = vpack.c.bf16 %v979_v41, %v977_v40  ;;  %v982_v40 = vsel %vm909_vm3, %v980_v44, %v981_v26  ;;  %v274_v41 = vunpack.c.l.bf16 %v4449_v46  ;;  %v279_v0 = vunpack.c.l.bf16 %v225_v54 }
  0x5f   : > { %3382 = vmatmul.mubr.msk.bf16.gmra.mrb[16].mxu0 %vm483_vm2, %v4400_v2  ;;  %v987_v53 = vsel %vm909_vm3, %v985_v20, %v986_v63  ;;  %v989_v18 = vsel %vm909_vm3, %v986_v63, %v988_v13  ;;  %v4464_v42 = vpack.c.bf16 %v984_v48, %v982_v40  ;;  %v1486_v20 = vrot.slane %v275_v59, 1  ;;  %v288_v59 = vld [vmem:[%s4833_s1 + $0x10] sm:$0x3] }
  0x60   : > { %3385 = vmatprep.mubr.msk.bf16.mxu0 %vm483_vm2, %v4404_v25  ;;  %v4468_v44 = vpack.c.bf16 %v989_v18, %v987_v53  ;;  %v1692_v26 = vrot.slane %v274_v41, 2  ;;  %v1485_v6 = vrot.slane %v274_v41, 1  ;;  %v1696_v13 = vsel %vm909_vm3, %v1693_v4, %v1695_v61 }
  0x61   : > { %v1489_v48 = vsel %vm354_vm1, %v1486_v20, %v1488_v36  ;;  %v2114_v41 = vsel %vm532_vm0, %v4242_v47, 0  ;;  %v1287_v47 = vsel %vm532_vm0, %v4396_v32, 0 }
  0x62   : > { %v1694_v63 = vsel %vm909_vm3, %v1692_v26, %v1693_v4  ;;  %v1487_v40 = vsel %vm354_vm1, %v1485_v6, %v1486_v20  ;;  %v2312_v26 = vrot.slane %v279_v0, 2  ;;  %v2321_v20 = vsel %vm532_vm0, %v288_v59, 0 }
  0x63   : > { %v4478_v53 = vpack.c.bf16 %v1489_v48, %v1487_v40  ;;  %v4482_v18 = vpack.c.bf16 %v1696_v13, %v1694_v63 }
  0x64   : > { %3234 = vmatmul.mubr.msk.bf16.gmra.mrb[4].mxu1 %vm483_vm2, %v3921_v27 }
  0x65   : > { %3237 = vmatprep.mubr.msk.bf16.mxu1 %vm483_vm2, %v3933_v35 }
  0x67   : > { %3386 = vmatmul.mubr.msk.bf16.gmra.mrb[20].mxu0 %vm483_vm2, %v4430_v22 }
  0x68   : > { %3389 = vmatprep.mubr.msk.bf16.mxu0 %vm483_vm2, %v4438_v45 }
  0x6c   : > { %3238 = vmatmul.mubr.msk.bf16.gmra.mrb[8].mxu1 %vm483_vm2, %v3961_v49 }
  0x6d   : > { %3241 = vmatprep.mubr.msk.bf16.mxu1 %vm483_vm2, %v3971_v55 }
  0x6f   : > { %3390 = vmatmul.mubr.msk.bf16.gmra.mrb[24].mxu0 %vm483_vm2, %v4464_v42 }
  0x70   : > { %3393 = vmatprep.mubr.msk.bf16.mxu0 %vm483_vm2, %v4468_v44 }
  0x74   : > { %3242 = vmatmul.mubr.msk.bf16.gmra.mrb[12].mxu1 %vm483_vm2, %v4005_v19 }
  0x75   : > { %3245 = vmatprep.mubr.msk.bf16.mxu1 %vm483_vm2, %v4041_v51 }
  0x77   : > { %3394 = vmatmul.mubr.msk.bf16.gmra.mrb[28].mxu0 %vm483_vm2, %v4482_v18 }
  0x78   : > { %3399 = vmatprep.mubr.msk.bf16.mxu0 %vm483_vm2, %v3898_v14 }
  0x7c   : > { %3246 = vmatmul.mubr.msk.bf16.gmra.mrb[16].mxu1 %vm483_vm2, %v4066_v30 }
  0x7d   : > { %3249 = vmatprep.mubr.msk.bf16.mxu1 %vm483_vm2, %v4084_v50 }
  0x7f   : > { %3400 = vmatmul.mubr.msk.bf16.vlgmr.msra.gmra.mrb[0].mxu0 %vm483_vm2, %v3921_v27 }
  0x80   : > { %3432 = vmatpush3.bf16.msra.mxu0 %v2114_v41  ;;  %3403 = vmatprep.mubr.msk.bf16.mxu0 %vm483_vm2, %v3933_v35 }
  0x81   : > { %3766 = vmatprep.subr.msk.bf16.mxu0 %vm532_vm0, %v288_v59 }
  0x84   : > { %3250 = vmatmul.mubr.msk.bf16.gmra.mrb[20].mxu1 %vm483_vm2, %v4122_v31 }
  0x85   : > { %3253 = vmatprep.mubr.msk.bf16.mxu1 %vm483_vm2, %v4140_v15 }
  0x87   : > { %3404 = vmatmul.mubr.msk.bf16.gmra.mrb[4].mxu0 %vm483_vm2, %v3961_v49 }
  0x88   : > { %3407 = vmatprep.mubr.msk.bf16.mxu0 %vm483_vm2, %v3971_v55 }
  0x8c   : > { %3254 = vmatmul.mubr.msk.bf16.gmra.mrb[24].mxu1 %vm483_vm2, %v4191_v11 }
  0x8d   : > { %3257 = vmatprep.mubr.msk.bf16.mxu1 %vm483_vm2, %v4210_v38 }
  0x8f   : > { %3408 = vmatmul.mubr.msk.bf16.gmra.mrb[8].mxu0 %vm483_vm2, %v4005_v19 }
  0x90   : > { %3411 = vmatprep.mubr.msk.bf16.mxu0 %vm483_vm2, %v4041_v51 }
  0x94   : > { %3258 = vmatmul.mubr.msk.bf16.gmra.mrb[28].mxu1 %vm483_vm2, %v4267_v52 }
  0x95   : > { %3263 = vmatprep.mubr.msk.bf16.mxu1 %vm483_vm2, %v1022_v24 }
  0x97   : > { %3412 = vmatmul.mubr.msk.bf16.gmra.mrb[12].mxu0 %vm483_vm2, %v4066_v30 }
  0x98   : > { %3415 = vmatprep.mubr.msk.bf16.mxu0 %vm483_vm2, %v4084_v50 }
  0x9c   : > { %3264 = vmatmul.mubr.msk.bf16.vlgmr.msra.gmra.mrb[0].mxu1 %vm483_vm2, %v4131_v9 }
  0x9d   : > { %3296 = vmatpush3.bf16.msra.mxu1 %v1287_v47  ;;  %3267 = vmatprep.mubr.msk.bf16.mxu1 %vm483_vm2, %v4179_v37 }
  0x9e   : > { %3762 = vmatprep.subr.msk.bf16.mxu1 %vm532_vm0, %v3854_v1  ;;  %v223_v1 = vld [vmem:[%s3879_s25 + $0xcc] sm:$0xff]  }
  0x9f   : > { %3416 = vmatmul.mubr.msk.bf16.gmra.mrb[16].mxu0 %vm483_vm2, %v4122_v31  ;;  %v277_v9 = vunpack.c.l.bf16 %v223_v1  ;;  %v278_v29 = vunpack.c.h.bf16 %v223_v1 }
  0xa0   : > { %3419 = vmatprep.mubr.msk.bf16.mxu0 %vm483_vm2, %v4140_v15 }
  0xa1   : > { %v2309_v24 = vrot.slane %v277_v9, 2  ;;  %v2310_v32 = vrot.slane %v278_v29, 2 }
  0xa3   : > { %v4563_v4 = vsel %vm909_vm3, %v2309_v24, %v2310_v32  ;;  %v4568_v61 = vsel %vm909_vm3, %v2310_v32, %v2312_v26 }
  0xa4   : > { %3268 = vmatmul.mubr.msk.bf16.gmra.mrb[4].mxu1 %vm483_vm2, %v4227_v62  ;;  %v2316_v6 = vpack.c.bf16 %v4568_v61, %v4563_v4 }
  0xa5   : > { %3271 = vmatprep.mubr.msk.bf16.mxu1 %vm483_vm2, %v4258_v33 }
  0xa7   : > { %3420 = vmatmul.mubr.msk.bf16.gmra.mrb[20].mxu0 %vm483_vm2, %v4191_v11 }
  0xa8   : > { %3423 = vmatprep.mubr.msk.bf16.mxu0 %vm483_vm2, %v4210_v38 }
  0xac   : > { %3272 = vmatmul.mubr.msk.bf16.gmra.mrb[8].mxu1 %vm483_vm2, %v4274_v23 }
  0xad   : > { %3275 = vmatprep.mubr.msk.bf16.mxu1 %vm483_vm2, %v4319_v17 }
  0xaf   : > { %3424 = vmatmul.mubr.msk.bf16.gmra.mrb[24].mxu0 %vm483_vm2, %v4267_v52 }
  0xb0   : > { %3427 = vmatprep.mubr.msk.bf16.mxu0 %vm483_vm2, %v4449_v46 }
  0xb4   : > { %3276 = vmatmul.mubr.msk.bf16.gmra.mrb[12].mxu1 %vm483_vm2, %v4321_v39 }
  0xb5   : > { %3279 = vmatprep.mubr.msk.bf16.mxu1 %vm483_vm2, %v4360_v7 }
  0xb7   : > { %3428 = vmatmul.mubr.msk.bf16.gmra.mrb[28].mxu0 %vm483_vm2, %v223_v1 }
  0xb8   : > { %3433 = vmatprep.mubr.msk.bf16.mxu0 %vm483_vm2, %v3973_v56  ;;  %v4913_v56 = vld [vmem:[#allocation3_spill] sm:$0xff] }
  0xbc   : > { %3280 = vmatmul.mubr.msk.bf16.gmra.mrb[16].mxu1 %vm483_vm2, %v4369_v12 }
  0xbd   : > { %3283 = vmatprep.mubr.msk.bf16.mxu1 %vm483_vm2, %v4400_v2 }
  0xbf   : > { %3434 = vmatmul.mubr.msk.bf16.vlgmr.msra.gmra.mrb[0].mxu0 %vm483_vm2, %v4007_v21  ;;  %v2105_v21 = vrot.slane %v279_v0, 1 }
  0xc0   : > { %3466 = vmatpush3.bf16.msra.mxu0 %v2321_v20  ;;  %3437 = vmatprep.mubr.msk.bf16.mxu0 %vm483_vm2, %v4016_v28 }
  0xc4   : > { %3284 = vmatmul.mubr.msk.bf16.gmra.mrb[20].mxu1 %vm483_vm2, %v4404_v25 }
  0xc5   : > { %3287 = vmatprep.mubr.msk.bf16.mxu1 %vm483_vm2, %v4430_v22 }
  0xc7   : > { %3438 = vmatmul.mubr.msk.bf16.gmra.mrb[4].mxu0 %vm483_vm2, %v4045_v57 }
  0xc8   : > { %3441 = vmatprep.mubr.msk.bf16.mxu0 %vm483_vm2, %v4079_v10  ;;  %v4912_v10 = vld [vmem:[#allocation2_spill] sm:$0xff] }
  0xcc   : > { %3288 = vmatmul.mubr.msk.bf16.gmra.mrb[24].mxu1 %vm483_vm2, %v4438_v45 }
  0xcd   : > { %3291 = vmatprep.mubr.msk.bf16.mxu1 %vm483_vm2, %v4464_v42 }
  0xcf   : > { %3442 = vmatmul.mubr.msk.bf16.gmra.mrb[8].mxu0 %vm483_vm2, %v4099_v60 }
  0xd0   : > { %3445 = vmatprep.mubr.msk.bf16.mxu0 %vm483_vm2, %v4142_v16 }
  0xd4   : > { %3292 = vmatmul.mubr.msk.bf16.gmra.mrb[28].mxu1 %vm483_vm2, %v4468_v44 }
  0xd5   : > { %3297 = vmatprep.mubr.msk.bf16.mxu1 %vm483_vm2, %v3888_v8  ;;  %v4914_v8 = vld [vmem:[#allocation4_spill] sm:$0xff] }
  0xd7   : > { %3446 = vmatmul.mubr.msk.bf16.gmra.mrb[12].mxu0 %vm483_vm2, %v4177_v43 }
  0xd8   : > { %3449 = vmatprep.mubr.msk.bf16.mxu0 %vm483_vm2, %v4183_v34 }
  0xdc   : > { %3298 = vmatmul.mubr.msk.bf16.vlgmr.msra.gmra.mrb[0].mxu1 %vm483_vm2, %v3898_v14  ;;  %v2102_v14 = vrot.slane %v277_v9, 1 }
  0xdd   : > { %3500 = vmatpush3.bf16.msra.mxu1 %v4912_v10  ;;  %3301 = vmatprep.mubr.msk.bf16.mxu1 %vm483_vm2, %v3921_v27  ;;  %v2103_v27 = vrot.slane %v278_v29, 1 }
  0xdf   : > { %3450 = vmatmul.mubr.msk.bf16.gmra.mrb[16].mxu0 %vm483_vm2, %v4913_v56 }
  0xe0   : > { %3453 = vmatprep.mubr.msk.bf16.mxu0 %vm483_vm2, %v4254_v5 }
  0xe4   : > { %3302 = vmatmul.mubr.msk.bf16.gmra.mrb[4].mxu1 %vm483_vm2, %v3933_v35  ;;  %v2104_v35 = vsel %vm354_vm1, %v2102_v14, %v2103_v27 }
  0xe5   : > { %3305 = vmatprep.mubr.msk.bf16.mxu1 %vm483_vm2, %v3961_v49  ;;  %v2106_v49 = vsel %vm354_vm1, %v2103_v27, %v2105_v21 }
  0xe7   : > { %3454 = vmatmul.mubr.msk.bf16.gmra.mrb[20].mxu0 %vm483_vm2, %v4302_v3 }
  0xe8   : > { %3457 = vmatprep.mubr.msk.bf16.mxu0 %vm483_vm2, %v4914_v8 }
  0xec   : > { %3306 = vmatmul.mubr.msk.bf16.gmra.mrb[8].mxu1 %vm483_vm2, %v3971_v55  ;;  %v2109_v55 = vpack.c.bf16 %v2106_v49, %v2104_v35 }
  0xed   : > { %3309 = vmatprep.mubr.msk.bf16.mxu1 %vm483_vm2, %v4005_v19 }
  0xef   : > { %3458 = vmatmul.mubr.msk.bf16.gmra.mrb[24].mxu0 %vm483_vm2, %v4347_v58 }
  0xf0   : > { %3461 = vmatprep.mubr.msk.bf16.mxu0 %vm483_vm2, %v4478_v53 }
  0xf4   : > { %3310 = vmatmul.mubr.msk.bf16.gmra.mrb[12].mxu1 %vm483_vm2, %v4041_v51 }
  0xf5   : > { %3313 = vmatprep.mubr.msk.bf16.mxu1 %vm483_vm2, %v4066_v30 }
  0xf7   : > { %3462 = vmatmul.mubr.msk.bf16.gmra.mrb[28].mxu0 %vm483_vm2, %v2109_v55 }
  0xf8   : > { %3467 = vmatprep.mubr.msk.bf16.mxu0 %vm483_vm2, %v4179_v37 }
  0xfc   : > { %3314 = vmatmul.mubr.msk.bf16.gmra.mrb[16].mxu1 %vm483_vm2, %v4084_v50 }
  0xfd   : > { %3317 = vmatprep.mubr.msk.bf16.mxu1 %vm483_vm2, %v4122_v31 }
  0xff   : > { %3468 = vmatmul.mubr.msk.bf16.vlgmr.msra.gmra.mrb[0].mxu0 %vm483_vm2, %v4227_v62 }
 0x100   : > { %3471 = vmatprep.mubr.msk.bf16.mxu0 %vm483_vm2, %v4258_v33 }
 0x104   : > { %3318 = vmatmul.mubr.msk.bf16.gmra.mrb[20].mxu1 %vm483_vm2, %v4140_v15 }
 0x105   : > { %3321 = vmatprep.mubr.msk.bf16.mxu1 %vm483_vm2, %v4191_v11 }
 0x107   : > { %3472 = vmatmul.mubr.msk.bf16.gmra.mrb[4].mxu0 %vm483_vm2, %v4274_v23 }
 0x108   : > { %3475 = vmatprep.mubr.msk.bf16.mxu0 %vm483_vm2, %v4319_v17 }
 0x10c   : > { %3322 = vmatmul.mubr.msk.bf16.gmra.mrb[24].mxu1 %vm483_vm2, %v4210_v38 }
 0x10d   : > { %3325 = vmatprep.mubr.msk.bf16.mxu1 %vm483_vm2, %v4267_v52 }
 0x10f   : > { %3476 = vmatmul.mubr.msk.bf16.gmra.mrb[8].mxu0 %vm483_vm2, %v4321_v39 }
 0x110   : > { %3479 = vmatprep.mubr.msk.bf16.mxu0 %vm483_vm2, %v4360_v7 }
 0x114   : > { %3326 = vmatmul.mubr.msk.bf16.gmra.mrb[28].mxu1 %vm483_vm2, %v4449_v46 }
 0x115   : > { %3347 = vmatprep.mubr.msk.bf16.mxu1 %vm483_vm2, %v4177_v43 }
 0x117   : > { %3480 = vmatmul.mubr.msk.bf16.gmra.mrb[12].mxu0 %vm483_vm2, %v4369_v12 }
 0x118   : > { %3483 = vmatprep.mubr.msk.bf16.mxu0 %vm483_vm2, %v4400_v2 }
 0x11c   : > { %3348 = vmatmul.mubr.msk.bf16.vlgmr.msra.gmra.mrb[16].mxu1 %vm483_vm2, %v4183_v34 }
 0x11d   : > { %3351 = vmatprep.mubr.msk.bf16.mxu1 %vm483_vm2, %v4913_v56 }
 0x11f   : > { %3484 = vmatmul.mubr.msk.bf16.gmra.mrb[16].mxu0 %vm483_vm2, %v4404_v25 }
 0x120   : > { %3487 = vmatprep.mubr.msk.bf16.mxu0 %vm483_vm2, %v4430_v22 }
 0x124   : > { %3352 = vmatmul.mubr.msk.bf16.gmra.mrb[20].mxu1 %vm483_vm2, %v4254_v5  ;;  %v4719_v5 = vld [vmem:[%s4834_s2] ss:$0 sm:$0xff] }
 0x125   : > { %3355 = vmatprep.mubr.msk.bf16.mxu1 %vm483_vm2, %v4302_v3 }
 0x127   : > { %3488 = vmatmul.mubr.msk.bf16.gmra.mrb[20].mxu0 %vm483_vm2, %v4438_v45 }
 0x128   : > { %3491 = vmatprep.mubr.msk.bf16.mxu0 %vm483_vm2, %v4464_v42 }
 0x12c   : > { %3356 = vmatmul.mubr.msk.bf16.gmra.mrb[24].mxu1 %vm483_vm2, %v4914_v8 }
 0x12d   : > { %3359 = vmatprep.mubr.msk.bf16.mxu1 %vm483_vm2, %v4347_v58 }
 0x12f   : > { %3492 = vmatmul.mubr.msk.bf16.gmra.mrb[24].mxu0 %vm483_vm2, %v4468_v44 }
 0x130   : > { %3495 = vmatprep.mubr.msk.bf16.mxu0 %vm483_vm2, %v4482_v18 }
 0x134   : > { %3360 = vmatmul.mubr.msk.bf16.gmra.mrb[28].mxu1 %vm483_vm2, %v4478_v53 }
 0x137   : > { %3496 = vmatmul.mubr.msk.bf16.gmra.mrb[28].mxu0 %vm483_vm2, %v2316_v6 }
 0x1af   : > { %v3299_v19 = vpop.f32.mrb[0].mxu1 }
 0x1b0   : > { %v1323_v28 = vpop.f32.mrb[1].mxu1 }
 0x1b1   : > { %v3300_v50 = vpop.f32.mrb[2].mxu1 }
 0x1b2   : > { %v1326_v51 = vpop.f32.mrb[3].mxu1 }
 0x1b7   : > { %v3303_v57 = vpop.f32.mrb[4].mxu1 }
 0x1b8   : > { %v1339_v30 = vpop.f32.mrb[5].mxu1 }
 0x1b9   : > { %v3304_v16 = vpop.f32.mrb[6].mxu1 }
 0x1ba   : > { %v1342_v60 = vpop.f32.mrb[7].mxu1 }
 0x1bf   : > { %v3307_v31 = vpop.f32.mrb[8].mxu1 }
 0x1c0   : > { %v1355_v15 = vpop.f32.mrb[9].mxu1 }
 0x1c1   : > { %v4704_v11 = vpop.f32.mrb[10].mxu1 }
 0x1c2   : > { %v4706_v43 = vpop.f32.mrb[11].mxu1 }
 0x1c7   : > { %v4708_v37 = vpop.f32.mrb[12].mxu1 }
 0x1c8   : > { %v4710_v34 = vpop.f32.mrb[13].mxu1 }
 0x1c9   : > { %v4712_v38 = vpop.f32.mrb[14].mxu1 }
 0x1ca   : > { %v4714_v62 = vpop.f32.mrb[15].mxu1 }
 0x1d2   : > { %v3469_v33 = vpop.f32.mrb[0].mxu0 }
 0x1d3   : > { %v3501_v52 = vadd.f32 %v3469_v33, %v3299_v19  ;;  %v2357_v23 = vpop.f32.mrb[1].mxu0 }
 0x1d4   : > { %v3502_v3 = vadd.f32 %v2357_v23, %v1323_v28  ;;  %v3470_v17 = vpop.f32.mrb[2].mxu0 }
 0x1d5   : > { %v2524_v39 = vadd.f32 %v3501_v52, %v4719_v5  ;;  %v3503_v58 = vadd.f32 %v3470_v17, %v3300_v50  ;;  %v2360_v7 = vpop.f32.mrb[3].mxu0 }
 0x1d6   : > { %v2522_v12 = vadd.f32 %v3502_v3, %v4719_v5  ;;  %v3504_v2 = vadd.f32 %v2360_v7, %v1326_v51 }
 0x1d7   : > { %v2556_v25 = vmax.f32 %v2524_v39, 0.0  ;;  %v2525_v22 = vadd.f32 %v3503_v58, %v4719_v5 }
 0x1d8   : > { %v2554_v45 = vmax.f32 %v2522_v12, 0.0  ;;  %v2523_v46 = vadd.f32 %v3504_v2, %v4719_v5 }
 0x1d9   : > { %v3010_v42 = vpack.c.bf16 %v2556_v25, %v2556_v25  ;;  %v2557_v44 = vmax.f32 %v2525_v22, 0.0 }
 0x1da   : > { %v3008_v36 = vpack.c.bf16 %v2554_v45, %v2554_v45  ;;  %v2555_v63 = vmax.f32 %v2523_v46, 0.0  ;;  %v3473_v13 = vpop.f32.mrb[4].mxu0 }
 0x1db   : > { %2717 = vst.msk [vmem:[%s4728_s16 + $0x8] sm:$0xf] %vm2714_vm4, %v3010_v42  ;;  %v3011_v40 = vpack.c.bf16 %v2557_v44, %v2557_v44  ;;  %v3505_v48 = vadd.f32 %v3473_v13, %v3303_v57  ;;  %v2373_v53 = vpop.f32.mrb[5].mxu0 }
 0x1dc   : > { %2715 = vst.msk [vmem:[%s4728_s16] sm:$0xf] %vm2714_vm4, %v3008_v36  ;;  %v3009_v18 = vpack.c.bf16 %v2555_v63, %v2555_v63  ;;  %v3506_v41 = vadd.f32 %v2373_v53, %v1339_v30  ;;  %v3474_v59 = vpop.f32.mrb[6].mxu0 }
 0x1dd   : > { %2718 = vst.msk [vmem:[%s4728_s16 + $0xc] sm:$0xf] %vm2714_vm4, %v3011_v40  ;;  %v2528_v47 = vadd.f32 %v3505_v48, %v4719_v5  ;;  %v3507_v1 = vadd.f32 %v3474_v59, %v3304_v16  ;;  %v2376_v9 = vpop.f32.mrb[7].mxu0 }
 0x1de   : > { %2716 = vst.msk [vmem:[%s4728_s16 + $0x4] sm:$0xf] %vm2714_vm4, %v3009_v18  ;;  %v2526_v29 = vadd.f32 %v3506_v41, %v4719_v5  ;;  %v3508_v54 = vadd.f32 %v2376_v9, %v1342_v60 }
 0x1df   : > { %v2560_v24 = vmax.f32 %v2528_v47, 0.0  ;;  %v2529_v32 = vadd.f32 %v3507_v1, %v4719_v5 }
 0x1e0   : > { %v2558_v0 = vmax.f32 %v2526_v29, 0.0  ;;  %v2527_v26 = vadd.f32 %v3508_v54, %v4719_v5 }
 0x1e1   : > { %v3014_v4 = vpack.c.bf16 %v2560_v24, %v2560_v24  ;;  %v2561_v61 = vmax.f32 %v2529_v32, 0.0 }
 0x1e2   : > { %v3012_v6 = vpack.c.bf16 %v2558_v0, %v2558_v0  ;;  %v2559_v20 = vmax.f32 %v2527_v26, 0.0  ;;  %v3477_v10 = vpop.f32.mrb[8].mxu0 }
 0x1e3   : > { %2721 = vst.msk [vmem:[%s4728_s16 + $0x18] sm:$0xf] %vm2714_vm4, %v3014_v4  ;;  %v3015_v56 = vpack.c.bf16 %v2561_v61, %v2561_v61  ;;  %v3509_v8 = vadd.f32 %v3477_v10, %v3307_v31  ;;  %v2389_v14 = vpop.f32.mrb[9].mxu0 }
 0x1e4   : > { %2719 = vst.msk [vmem:[%s4728_s16 + $0x10] sm:$0xf] %vm2714_vm4, %v3012_v6  ;;  %v3013_v27 = vpack.c.bf16 %v2559_v20, %v2559_v20  ;;  %v3510_v21 = vadd.f32 %v2389_v14, %v1355_v15  ;;  %v3478_v35 = vpop.f32.mrb[10].mxu0 }
 0x1e5   : > { %2722 = vst.msk [vmem:[%s4728_s16 + $0x1c] sm:$0xf] %vm2714_vm4, %v3015_v56  ;;  %v2532_v49 = vadd.f32 %v3509_v8, %v4719_v5  ;;  %v3511_v55 = vadd.f32 %v3478_v35, %v4704_v11  ;;  %v2392_v19 = vpop.f32.mrb[11].mxu0 }
 0x1e6   : > { %2720 = vst.msk [vmem:[%s4728_s16 + $0x14] sm:$0xf] %vm2714_vm4, %v3013_v27  ;;  %v2530_v28 = vadd.f32 %v3510_v21, %v4719_v5  ;;  %v3512_v50 = vadd.f32 %v2392_v19, %v4706_v43 }
 0x1e7   : > { %v2564_v51 = vmax.f32 %v2532_v49, 0.0  ;;  %v2533_v57 = vadd.f32 %v3511_v55, %v4719_v5 }
 0x1e8   : > { %v2562_v30 = vmax.f32 %v2530_v28, 0.0  ;;  %v2531_v16 = vadd.f32 %v3512_v50, %v4719_v5 }
 0x1e9   : > { %v3018_v60 = vpack.c.bf16 %v2564_v51, %v2564_v51  ;;  %v2565_v31 = vmax.f32 %v2533_v57, 0.0 }
 0x1ea   : > { %v3016_v15 = vpack.c.bf16 %v2562_v30, %v2562_v30  ;;  %v2563_v11 = vmax.f32 %v2531_v16, 0.0  ;;  %v3481_v33 = vpop.f32.mrb[12].mxu0 }
 0x1eb   : > { %2725 = vst.msk [vmem:[%s4728_s16 + $0x28] sm:$0xf] %vm2714_vm4, %v3018_v60  ;;  %v3019_v52 = vpack.c.bf16 %v2565_v31, %v2565_v31  ;;  %v3513_v23 = vadd.f32 %v3481_v33, %v4708_v37  ;;  %v2405_v3 = vpop.f32.mrb[13].mxu0 }
 0x1ec   : > { %2723 = vst.msk [vmem:[%s4728_s16 + $0x20] sm:$0xf] %vm2714_vm4, %v3016_v15  ;;  %v3017_v43 = vpack.c.bf16 %v2563_v11, %v2563_v11  ;;  %v3514_v17 = vadd.f32 %v2405_v3, %v4710_v34  ;;  %v3482_v39 = vpop.f32.mrb[14].mxu0 }
 0x1ed   : > { %2726 = vst.msk [vmem:[%s4728_s16 + $0x2c] sm:$0xf] %vm2714_vm4, %v3019_v52  ;;  %v2536_v58 = vadd.f32 %v3513_v23, %v4719_v5  ;;  %v3515_v7 = vadd.f32 %v3482_v39, %v4712_v38  ;;  %v2408_v12 = vpop.f32.mrb[15].mxu0 }
 0x1ee   : > { %2724 = vst.msk [vmem:[%s4728_s16 + $0x24] sm:$0xf] %vm2714_vm4, %v3017_v43  ;;  %v2534_v2 = vadd.f32 %v3514_v17, %v4719_v5  ;;  %v3516_v37 = vadd.f32 %v2408_v12, %v4714_v62 }
 0x1ef   : > { %v3349_v25 = vpop.f32.mrb[16].mxu1  ;;  %v2568_v22 = vmax.f32 %v2536_v58, 0.0  ;;  %v2537_v34 = vadd.f32 %v3515_v7, %v4719_v5 }
 0x1f0   : > { %v1597_v45 = vpop.f32.mrb[17].mxu1  ;;  %v2566_v46 = vmax.f32 %v2534_v2, 0.0  ;;  %v2535_v42 = vadd.f32 %v3516_v37, %v4719_v5 }
 0x1f1   : > { %v3350_v44 = vpop.f32.mrb[18].mxu1  ;;  %v3022_v38 = vpack.c.bf16 %v2568_v22, %v2568_v22  ;;  %v2569_v36 = vmax.f32 %v2537_v34, 0.0 }
 0x1f2   : > { %v1600_v63 = vpop.f32.mrb[19].mxu1  ;;  %v3020_v13 = vpack.c.bf16 %v2566_v46, %v2566_v46  ;;  %v2567_v40 = vmax.f32 %v2535_v42, 0.0  ;;  %v3485_v48 = vpop.f32.mrb[16].mxu0 }
 0x1f3   : > { %2729 = vst.msk [vmem:[%s4728_s16 + $0x38] sm:$0xf] %vm2714_vm4, %v3022_v38  ;;  %v3023_v62 = vpack.c.bf16 %v2569_v36, %v2569_v36  ;;  %v3517_v53 = vadd.f32 %v3485_v48, %v3349_v25  ;;  %v2421_v18 = vpop.f32.mrb[17].mxu0 }
 0x1f4   : > { %2727 = vst.msk [vmem:[%s4728_s16 + $0x30] sm:$0xf] %vm2714_vm4, %v3020_v13  ;;  %v3021_v41 = vpack.c.bf16 %v2567_v40, %v2567_v40  ;;  %v3518_v59 = vadd.f32 %v2421_v18, %v1597_v45  ;;  %v3486_v47 = vpop.f32.mrb[18].mxu0 }
 0x1f5   : > { %2730 = vst.msk [vmem:[%s4728_s16 + $0x3c] sm:$0xf] %vm2714_vm4, %v3023_v62  ;;  %v2540_v1 = vadd.f32 %v3517_v53, %v4719_v5  ;;  %v3519_v9 = vadd.f32 %v3486_v47, %v3350_v44  ;;  %v2424_v29 = vpop.f32.mrb[19].mxu0 }
 0x1f6   : > { %2728 = vst.msk [vmem:[%s4728_s16 + $0x34] sm:$0xf] %vm2714_vm4, %v3021_v41  ;;  %v2538_v54 = vadd.f32 %v3518_v59, %v4719_v5  ;;  %v3520_v24 = vadd.f32 %v2424_v29, %v1600_v63 }
 0x1f7   : > { %v3353_v32 = vpop.f32.mrb[20].mxu1  ;;  %v2572_v0 = vmax.f32 %v2540_v1, 0.0  ;;  %v2541_v26 = vadd.f32 %v3519_v9, %v4719_v5 }
 0x1f8   : > { %v1613_v4 = vpop.f32.mrb[21].mxu1  ;;  %v2570_v61 = vmax.f32 %v2538_v54, 0.0  ;;  %v2539_v6 = vadd.f32 %v3520_v24, %v4719_v5 }
 0x1f9   : > { %v3354_v20 = vpop.f32.mrb[22].mxu1  ;;  %v3026_v10 = vpack.c.bf16 %v2572_v0, %v2572_v0  ;;  %v2573_v56 = vmax.f32 %v2541_v26, 0.0 }
 0x1fa   : > { %v1616_v8 = vpop.f32.mrb[23].mxu1  ;;  %v3024_v14 = vpack.c.bf16 %v2570_v61, %v2570_v61  ;;  %v2571_v27 = vmax.f32 %v2539_v6, 0.0  ;;  %v3489_v21 = vpop.f32.mrb[20].mxu0 }
 0x1fb   : > { %2733 = vst.msk [vmem:[%s4728_s16 + $0x48] sm:$0xf] %vm2714_vm4, %v3026_v10  ;;  %v3027_v35 = vpack.c.bf16 %v2573_v56, %v2573_v56  ;;  %v3521_v49 = vadd.f32 %v3489_v21, %v3353_v32  ;;  %v2437_v55 = vpop.f32.mrb[21].mxu0 }
 0x1fc   : > { %2731 = vst.msk [vmem:[%s4728_s16 + $0x40] sm:$0xf] %vm2714_vm4, %v3024_v14  ;;  %v3025_v19 = vpack.c.bf16 %v2571_v27, %v2571_v27  ;;  %v3522_v28 = vadd.f32 %v2437_v55, %v1613_v4  ;;  %v3490_v50 = vpop.f32.mrb[22].mxu0 }
 0x1fd   : > { %2734 = vst.msk [vmem:[%s4728_s16 + $0x4c] sm:$0xf] %vm2714_vm4, %v3027_v35  ;;  %v2544_v51 = vadd.f32 %v3521_v49, %v4719_v5  ;;  %v3523_v57 = vadd.f32 %v3490_v50, %v3354_v20  ;;  %v2440_v30 = vpop.f32.mrb[23].mxu0 }
 0x1fe   : > { %2732 = vst.msk [vmem:[%s4728_s16 + $0x44] sm:$0xf] %vm2714_vm4, %v3025_v19  ;;  %v2542_v16 = vadd.f32 %v3522_v28, %v4719_v5  ;;  %v3524_v60 = vadd.f32 %v2440_v30, %v1616_v8 }
 0x1ff   : > { %v3357_v31 = vpop.f32.mrb[24].mxu1  ;;  %v2576_v15 = vmax.f32 %v2544_v51, 0.0  ;;  %v2545_v11 = vadd.f32 %v3523_v57, %v4719_v5 }
 0x200   : > { %v1629_v33 = vpop.f32.mrb[25].mxu1  ;;  %v2574_v52 = vmax.f32 %v2542_v16, 0.0  ;;  %v2543_v23 = vadd.f32 %v3524_v60, %v4719_v5 }
 0x201   : > { %v3358_v3 = vpop.f32.mrb[26].mxu1  ;;  %v3030_v43 = vpack.c.bf16 %v2576_v15, %v2576_v15  ;;  %v2577_v17 = vmax.f32 %v2545_v11, 0.0 }
 0x202   : > { %v1632_v39 = vpop.f32.mrb[27].mxu1  ;;  %v3028_v58 = vpack.c.bf16 %v2574_v52, %v2574_v52  ;;  %v2575_v7 = vmax.f32 %v2543_v23, 0.0  ;;  %v3493_v12 = vpop.f32.mrb[24].mxu0 }
 0x203   : > { %2737 = vst.msk [vmem:[%s4728_s16 + $0x58] sm:$0xf] %vm2714_vm4, %v3030_v43  ;;  %v3031_v2 = vpack.c.bf16 %v2577_v17, %v2577_v17  ;;  %v3525_v37 = vadd.f32 %v3493_v12, %v3357_v31  ;;  %v2453_v25 = vpop.f32.mrb[25].mxu0 }
 0x204   : > { %2735 = vst.msk [vmem:[%s4728_s16 + $0x50] sm:$0xf] %vm2714_vm4, %v3028_v58  ;;  %v3029_v22 = vpack.c.bf16 %v2575_v7, %v2575_v7  ;;  %v3526_v34 = vadd.f32 %v2453_v25, %v1629_v33  ;;  %v3494_v45 = vpop.f32.mrb[26].mxu0 }
 0x205   : > { %2738 = vst.msk [vmem:[%s4728_s16 + $0x5c] sm:$0xf] %vm2714_vm4, %v3031_v2  ;;  %v2548_v46 = vadd.f32 %v3525_v37, %v4719_v5  ;;  %v3527_v42 = vadd.f32 %v3494_v45, %v3358_v3  ;;  %v2456_v44 = vpop.f32.mrb[27].mxu0 }
 0x206   : > { %2736 = vst.msk [vmem:[%s4728_s16 + $0x54] sm:$0xf] %vm2714_vm4, %v3029_v22  ;;  %v2546_v38 = vadd.f32 %v3526_v34, %v4719_v5  ;;  %v3528_v36 = vadd.f32 %v2456_v44, %v1632_v39 }
 0x207   : > { %v3361_v63 = vpop.f32.mrb[28].mxu1  ;;  %v2580_v13 = vmax.f32 %v2548_v46, 0.0  ;;  %v2549_v40 = vadd.f32 %v3527_v42, %v4719_v5 }
 0x208   : > { %v1645_v48 = vpop.f32.mrb[29].mxu1  ;;  %v2578_v62 = vmax.f32 %v2546_v38, 0.0  ;;  %v2547_v53 = vadd.f32 %v3528_v36, %v4719_v5 }
 0x209   : > { %v3362_v18 = vpop.f32.mrb[30].mxu1  ;;  %v3034_v41 = vpack.c.bf16 %v2580_v13, %v2580_v13  ;;  %v2581_v59 = vmax.f32 %v2549_v40, 0.0 }
 0x20a   : > { %v1648_v47 = vpop.f32.mrb[31].mxu1  ;;  %v3032_v1 = vpack.c.bf16 %v2578_v62, %v2578_v62  ;;  %v2579_v9 = vmax.f32 %v2547_v53, 0.0  ;;  %v3497_v29 = vpop.f32.mrb[28].mxu0 }
 0x20b   : > { %2741 = vst.msk [vmem:[%s4728_s16 + $0x68] sm:$0xf] %vm2714_vm4, %v3034_v41  ;;  %v3035_v54 = vpack.c.bf16 %v2581_v59, %v2581_v59  ;;  %v3529_v24 = vadd.f32 %v3497_v29, %v3361_v63  ;;  %v2469_v32 = vpop.f32.mrb[29].mxu0 }
 0x20c   : > { %2739 = vst.msk [vmem:[%s4728_s16 + $0x60] sm:$0xf] %vm2714_vm4, %v3032_v1  ;;  %v3033_v0 = vpack.c.bf16 %v2579_v9, %v2579_v9  ;;  %v3530_v26 = vadd.f32 %v2469_v32, %v1645_v48  ;;  %v3498_v4 = vpop.f32.mrb[30].mxu0 }
 0x20d   : > { %2742 = vst.msk [vmem:[%s4728_s16 + $0x6c] sm:$0xf] %vm2714_vm4, %v3035_v54  ;;  %v2552_v61 = vadd.f32 %v3529_v24, %v4719_v5  ;;  %v3531_v6 = vadd.f32 %v3498_v4, %v3362_v18  ;;  %v2472_v20 = vpop.f32.mrb[31].mxu0 }
 0x20e   : > { %2740 = vst.msk [vmem:[%s4728_s16 + $0x64] sm:$0xf] %vm2714_vm4, %v3033_v0  ;;  %v2550_v10 = vadd.f32 %v3530_v26, %v4719_v5  ;;  %v3532_v56 = vadd.f32 %v2472_v20, %v1648_v47 }
 0x20f   : > { %v2584_v8 = vmax.f32 %v2552_v61, 0.0  ;;  %v2553_v14 = vadd.f32 %v3531_v6, %v4719_v5 }
 0x210   : > { %v2582_v27 = vmax.f32 %v2550_v10, 0.0  ;;  %v2551_v21 = vadd.f32 %v3532_v56, %v4719_v5 }
 0x211   : > { %v3038_v35 = vpack.c.bf16 %v2584_v8, %v2584_v8  ;;  %v2585_v49 = vmax.f32 %v2553_v14, 0.0 }
 0x212   : > { %v3036_v55 = vpack.c.bf16 %v2582_v27, %v2582_v27  ;;  %v2583_v19 = vmax.f32 %v2551_v21, 0.0 }
 0x213   : > { %2745 = vst.msk [vmem:[%s4728_s16 + $0x78] sm:$0xf] %vm2714_vm4, %v3038_v35  ;;  %v3039_v28 = vpack.c.bf16 %v2585_v49, %v2585_v49 }
 0x214   : > { %2743 = vst.msk [vmem:[%s4728_s16 + $0x70] sm:$0xf] %vm2714_vm4, %v3036_v55  ;;  %v3037_v50 = vpack.c.bf16 %v2583_v19, %v2583_v19 }
 0x215   : > { %2746 = vst.msk [vmem:[%s4728_s16 + $0x7c] sm:$0xf] %vm2714_vm4, %v3039_v28 }
 0x216   : > { %2744 = vst.msk [vmem:[%s4728_s16 + $0x74] sm:$0xf] %vm2714_vm4, %v3037_v50 }
 0x217 PF: > { %s13_s12 = sadd.s32 1, %s3818_s12  }
 0x218   : > { %p10_p4 = scmp.ge.s32.totalorder %s13_s12, 4  }
 0x21a   :  { %12 = sbr.rel (!%p10_p4) target bundleno = 1 (0x1), region = 62 }

</bundles_post_ra>
